<compile_context>
chip_gen: v7x
topology: tpu7x:2x2x1
jax: 0.10.0
libtpu: 0.0.40
codegen_flags: <defaults>
</compile_context>

<pallas_src>
import functools

import jax
import jax.numpy as jnp
import numpy as np
from jax.experimental import pallas as pl
from jax.experimental.pallas import tpu as pltpu


def _bilstm_kernel(lens_ref, gx_ref, whh_ref, y_ref, hlast_ref, h_scr, c_scr,
                   *, hidden_size, t_chunk):
    """Fused bidirectional LSTM recurrence.

    grid = (2, num_chunks): axis 0 = direction (0 fwd, 1 bwd, "parallel"),
    axis 1 = time chunk ("arbitrary", sequential).
    """
    H = hidden_size
    d = pl.program_id(0)
    c = pl.program_id(1)
    nc = pl.num_programs(1)

    @pl.when(c == 0)
    def _():
        h_scr[...] = jnp.zeros_like(h_scr)
        c_scr[...] = jnp.zeros_like(c_scr)

    # Block of time handled at this grid step (must match the index_map):
    # forward: c ; backward: nc - 1 - c.
    chunk_blk = c + d * (nc - 1 - 2 * c)
    chunk_t0 = chunk_blk * t_chunk

    whh = whh_ref[0]                       # (H, 4H), resident in VMEM
    lens = lens_ref[...]                   # (B, 1) int32

    def step(s, carry):
        h, c_state = carry
        # within-chunk time index: forward s ; backward t_chunk - 1 - s
        local_t = s + d * (t_chunk - 1 - 2 * s)
        tt = chunk_t0 + local_t

        # Serial work: only the hidden-state projection (input projection is
        # precomputed in gx_ref, streamed as bf16 and widened here).  Default
        # precision -> single bf16 MXU pass with f32 accumulation.
        gates = gx_ref[0, local_t].astype(jnp.float32) + jnp.dot(
            h, whh, preferred_element_type=jnp.float32)        # (B, 4H)

        # one full-width sigmoid + one tanh on the g slice (gate order i,f,g,o)
        sig = jax.nn.sigmoid(gates)
        i_g = sig[:, 0 * H:1 * H]
        f_g = sig[:, 1 * H:2 * H]
        o_g = sig[:, 3 * H:4 * H]
        g_g = jnp.tanh(gates[:, 2 * H:3 * H])

        c_new = f_g * c_state + i_g * g_g
        h_new = o_g * jnp.tanh(c_new)

        # padded positions neither emit output nor advance the state
        mask = lens > tt                                       # (B, 1) bool
        h_out = jnp.where(mask, h_new, h)
        c_out = jnp.where(mask, c_new, c_state)
        y_ref[0, local_t] = jnp.where(mask, h_new, 0.0).astype(y_ref.dtype)
        return h_out, c_out

    h_fin, c_fin = jax.lax.fori_loop(
        0, t_chunk, step, (h_scr[...], c_scr[...]), unroll=True)
    h_scr[...] = h_fin
    c_scr[...] = c_fin

    @pl.when(c == nc - 1)
    def _():
        hlast_ref[0] = h_fin.astype(hlast_ref.dtype)


def init_bilstm_params(key, input_size, hidden_size):
    """Deterministic params, PyTorch-style U(-1/sqrt(H), 1/sqrt(H)), stacked
    over the two directions (index 0 = forward, 1 = backward)."""
    k = 1.0 / np.sqrt(hidden_size)
    G = 4 * hidden_size
    keys = jax.random.split(key, 8)

    def u(kk, shape):
        return jax.random.uniform(kk, shape, jnp.float32, minval=-k, maxval=k)

    w_ih_t, w_hh_t, bias = [], [], []
    for d in range(2):
        w_ih = u(keys[4 * d + 0], (G, input_size))     # torch weight_ih_l0[_reverse]
        w_hh = u(keys[4 * d + 1], (G, hidden_size))    # torch weight_hh_l0[_reverse]
        b_ih = u(keys[4 * d + 2], (G,))
        b_hh = u(keys[4 * d + 3], (G,))
        w_ih_t.append(w_ih.T)                          # (E, 4H)
        w_hh_t.append(w_hh.T)                          # (H, 4H)
        bias.append((b_ih + b_hh).reshape(1, G))       # (1, 4H)
    return {
        "w_ih_t": jnp.stack(w_ih_t),                   # (2, E, 4H)
        "w_hh_t": jnp.stack(w_hh_t),                   # (2, H, 4H)
        "bias": jnp.stack(bias),                       # (2, 1, 4H)
    }


def bilstm_forward(emb_seqs, seq_lens, params, *, t_chunk=8,
                   x_gate_dtype=jnp.bfloat16):
    """emb_seqs: (B, T, E) f32, seq_lens: (B,) int ->
    (y: (B, max(seq_lens), 2H), hidden: (2, B, H))."""
    B, T, E = emb_seqs.shape
    w_ih_t = params["w_ih_t"]
    w_hh_t = params["w_hh_t"]
    bias = params["bias"]
    H = w_hh_t.shape[1]
    G = 4 * H

    x_tbe = jnp.transpose(emb_seqs, (1, 0, 2)).astype(jnp.float32)   # (T, B, E)

    # Hoisted input projection: one big MXU matmul (M = T*B) covering both
    # directions; removes W_ih entirely from the serial recurrence.  The
    # result (the dominant streamed tensor of the serial phase) is stored in
    # bf16 to halve HBM/VMEM traffic; the convert fuses into the einsum.
    gx = jnp.einsum("tbe,deg->dtbg", x_tbe, w_ih_t,
                    preferred_element_type=jnp.float32) + bias[:, None, :, :]
    gx = gx.astype(x_gate_dtype)                                     # (2, T, B, 4H)

    # Pad batch to a multiple of 16 sublanes (valid for f32 (8,128) and bf16
    # (16,128) tilings) and time to a multiple of t_chunk.  Pad rows get
    # length 0 -> state stays 0, y stays 0; padded timesteps are masked out
    # (lens <= T <= tt), so padding at the end is safe for both directions.
    Bp = max(16, -(-B // 16) * 16)
    tc = min(t_chunk, T)
    Tp = -(-T // tc) * tc
    nc = Tp // tc
    gx = jnp.pad(gx, ((0, 0), (0, Tp - T), (0, Bp - B), (0, 0)))
    lens = jnp.pad(seq_lens.astype(jnp.int32), (0, Bp - B)).reshape(Bp, 1)

    # forward direction walks chunks 0..nc-1, backward walks nc-1..0
    time_map = lambda d, c: (d, c + d * (nc - 1 - 2 * c), 0, 0)
    const_wh = lambda d, c: (d, 0, 0)

    kernel = functools.partial(_bilstm_kernel, hidden_size=H, t_chunk=tc)

    y, h_last = pl.pallas_call(
        kernel,
        grid=(2, nc),
        in_specs=[
            pl.BlockSpec((Bp, 1), lambda d, c: (0, 0)),      # seq lens
            pl.BlockSpec((1, tc, Bp, G), time_map),          # precomputed x-gates
            pl.BlockSpec((1, H, G), const_wh),               # W_hh^T (per direction)
        ],
        out_specs=[
            pl.BlockSpec((1, tc, Bp, H), time_map),          # y chunk slab
            pl.BlockSpec((1, Bp, H), const_wh),              # final hidden
        ],
        out_shape=(
            jax.ShapeDtypeStruct((2, Tp, Bp, H), jnp.float32),
            jax.ShapeDtypeStruct((2, Bp, H), jnp.float32),
        ),
        scratch_shapes=[
            pltpu.VMEM((Bp, H), jnp.float32),                # h carry
            pltpu.VMEM((Bp, H), jnp.float32),                # c carry
        ],
        compiler_params=pltpu.CompilerParams(
            # direction axis -> both TensorCores on v7x; time axis is serial.
            # For production sizes also raise vmem_limit_bytes here.
            dimension_semantics=("parallel", "arbitrary")),
    )(lens, gx, w_hh_t)

    # pad_packed_sequence returns max(seq_lens) timesteps.  Like the PyTorch
    # module (seq_lens.cpu()), this needs host-concrete lengths.
    t_out = int(np.max(np.asarray(jax.device_get(seq_lens))))
    y = y[:, :t_out, :B]                                     # (2, t_out, B, H)
    y = jnp.transpose(y, (2, 1, 0, 3)).reshape(B, t_out, 2 * H)
    hidden = h_last[:, :B]                                   # (2, B, H)
    return y, hidden


def _reference_bilstm(emb_seqs, seq_lens, params):
    """Pure-numpy f32 reference of the packed-BiLSTM semantics."""
    x = np.asarray(emb_seqs, np.float32)
    lens = np.asarray(seq_lens, np.int64)
    B, T, E = x.shape
    H = params["w_hh_t"].shape[1]

    def run(d, reverse):
        w_ih = np.asarray(params["w_ih_t"][d], np.float32)
        w_hh = np.asarray(params["w_hh_t"][d], np.float32)
        b = np.asarray(params["bias"][d], np.float32)[0]
        h = np.zeros((B, H), np.float32)
        c = np.zeros((B, H), np.float32)
        y = np.zeros((T, B, H), np.float32)
        order = range(T - 1, -1, -1) if reverse else range(T)
        for tt in order:
            gates = x[:, tt] @ w_ih + h @ w_hh + b
            i = 1.0 / (1.0 + np.exp(-gates[:, 0 * H:1 * H]))
            f = 1.0 / (1.0 + np.exp(-gates[:, 1 * H:2 * H]))
            g = np.tanh(gates[:, 2 * H:3 * H])
            o = 1.0 / (1.0 + np.exp(-gates[:, 3 * H:4 * H]))
            c_new = f * c + i * g
            h_new = o * np.tanh(c_new)
            m = (lens > tt)[:, None]
            h = np.where(m, h_new, h)
            c = np.where(m, c_new, c)
            y[tt] = np.where(m, h_new, 0.0)
        return y, h

    y_f, h_f = run(0, False)
    y_b, h_b = run(1, True)
    t_out = int(lens.max())
    y = np.concatenate([y_f.transpose(1, 0, 2), y_b.transpose(1, 0, 2)], -1)[:, :t_out]
    hidden = np.stack([h_f, h_b], 0)
    return y, hidden


if __name__ == "__main__":
    B, T, E, H = 2, 8, 16, 32
    key = jax.random.PRNGKey(0)
    k_x, k_p = jax.random.split(key)

    emb_seqs = jax.random.normal(k_x, (B, T, E), jnp.float32)
    seq_lens = jnp.array([8, 5], dtype=jnp.int32)     # max == T

    params = init_bilstm_params(k_p, E, H)

    y, hidden = bilstm_forward(emb_seqs, seq_lens, params)
    y = jax.block_until_ready(y)
    hidden = jax.block_until_ready(hidden)

    y_ref, h_ref = _reference_bilstm(emb_seqs, seq_lens, params)
    # bf16-streamed x-gates + default-precision (bf16 MXU pass, f32 accumulate)
    # recurrence matmul vs the exact f32 numpy reference -> loose tolerance.
    np.testing.assert_allclose(np.asarray(y), y_ref, rtol=5e-2, atol=5e-2)
    np.testing.assert_allclose(np.asarray(hidden), h_ref, rtol=5e-2, atol=5e-2)

    assert y.shape == (B, T, 2 * H) and hidden.shape == (2, B, H)
    print("KERNEL_OK")
</pallas_src>

<mosaic_0001>
module attributes {stable_mosaic.version = 11 : i64} {
  func.func @_bilstm_kernel(%arg0: i32, %arg1: i32, %arg2: memref<16x1xi32, #tpu.memory_space<vmem>>, %arg3: memref<1x8x16x128xbf16, #tpu.memory_space<vmem>>, %arg4: memref<1x32x128xf32, #tpu.memory_space<vmem>>, %arg5: memref<1x8x16x32xf32, #tpu.memory_space<vmem>>, %arg6: memref<1x16x32xf32, #tpu.memory_space<vmem>>, %arg7: memref<16x32xf32, #tpu.memory_space<vmem>>, %arg8: memref<16x32xf32, #tpu.memory_space<vmem>>) attributes {dimension_semantics = [#tpu.dimension_semantics<parallel>, #tpu.dimension_semantics<arbitrary>], iteration_bounds = array<i64: 2, 1>, scalar_prefetch = 0 : i64, scratch_operands = 2 : i64, tpu.core_type = #tpu.core_type<tc>, window_params = [{pipeline_mode = #tpu.pipeline_mode<synchronous>, transform_indices = @transform_0, window_bounds = array<i64: 16, 1>}, {transform_indices = @transform_1, window_bounds = array<i64: 1, 8, 16, 128>}, {transform_indices = @transform_2, window_bounds = array<i64: 1, 32, 128>}, {transform_indices = @transform_3, window_bounds = array<i64: 1, 8, 16, 32>}, {transform_indices = @transform_4, window_bounds = array<i64: 1, 16, 32>}]} {
    %c0_i32 = arith.constant 0 : i32
    %0 = arith.cmpi eq, %arg1, %c0_i32 : i32
    %1 = arith.extui %0 : i1 to i32
    %c0_i32_0 = arith.constant 0 : i32
    %2 = arith.cmpi ne, %1, %c0_i32_0 : i32
    scf.if %2 {
      %cst_106 = arith.constant 0.000000e+00 : f32
      %354 = vector.broadcast %cst_106 : f32 to vector<16x32xf32>
      %c0_107 = arith.constant 0 : index
      %c0_108 = arith.constant 0 : index
      %355 = vector.load %arg7[%c0_107, %c0_108] : memref<16x32xf32, #tpu.memory_space<vmem>>, vector<16x32xf32>
      tpu.vector_store %arg7[%c0_107, %c0_108], %354 {strides = array<i32>} : memref<16x32xf32, #tpu.memory_space<vmem>>, vector<16x32xf32>,
      %cst_109 = arith.constant 0.000000e+00 : f32
      %356 = vector.broadcast %cst_109 : f32 to vector<16x32xf32>
      %c0_110 = arith.constant 0 : index
      %c0_111 = arith.constant 0 : index
      %357 = vector.load %arg8[%c0_110, %c0_111] : memref<16x32xf32, #tpu.memory_space<vmem>>, vector<16x32xf32>
      tpu.vector_store %arg8[%c0_110, %c0_111], %356 {strides = array<i32>} : memref<16x32xf32, #tpu.memory_space<vmem>>, vector<16x32xf32>,
    } else {
    }
    %c2_i32 = arith.constant 2 : i32
    %3 = arith.muli %c2_i32, %arg1 : i32
    %c0_i32_1 = arith.constant 0 : i32
    %4 = arith.subi %c0_i32_1, %3 : i32
    %5 = arith.muli %arg0, %4 : i32
    %6 = arith.addi %arg1, %5 : i32
    %c8_i32 = arith.constant 8 : i32
    %7 = arith.muli %6, %c8_i32 : i32
    %c0 = arith.constant 0 : index
    %c0_2 = arith.constant 0 : index
    %c0_3 = arith.constant 0 : index
    %8 = vector.load %arg4[%c0, %c0_2, %c0_3] : memref<1x32x128xf32, #tpu.memory_space<vmem>>, vector<1x32x128xf32>
    %9 = vector.shape_cast %8 : vector<1x32x128xf32> to vector<32x128xf32>
    %c0_4 = arith.constant 0 : index
    %c0_5 = arith.constant 0 : index
    %10 = vector.load %arg2[%c0_4, %c0_5] : memref<16x1xi32, #tpu.memory_space<vmem>>, vector<16x1xi32>
    %c0_6 = arith.constant 0 : index
    %c0_7 = arith.constant 0 : index
    %11 = vector.load %arg7[%c0_6, %c0_7] : memref<16x32xf32, #tpu.memory_space<vmem>>, vector<16x32xf32>
    %c0_8 = arith.constant 0 : index
    %c0_9 = arith.constant 0 : index
    %12 = vector.load %arg8[%c0_8, %c0_9] : memref<16x32xf32, #tpu.memory_space<vmem>>, vector<16x32xf32>
    %c0_i32_10 = arith.constant 0 : i32
    %c2_i32_11 = arith.constant 2 : i32
    %13 = arith.muli %c2_i32_11, %c0_i32_10 : i32
    %c7_i32 = arith.constant 7 : i32
    %14 = arith.subi %c7_i32, %13 : i32
    %15 = arith.muli %arg0, %14 : i32
    %16 = arith.addi %c0_i32_10, %15 : i32
    %17 = arith.addi %7, %16 : i32
    %c0_12 = arith.constant 0 : index
    %18 = arith.index_cast %16 : i32 to index
    %c0_13 = arith.constant 0 : index
    %c0_14 = arith.constant 0 : index
    %19 = vector.load %arg3[%c0_12, %18, %c0_13, %c0_14] : memref<1x8x16x128xbf16, #tpu.memory_space<vmem>>, vector<1x1x16x128xbf16>
    %20 = vector.shape_cast %19 : vector<1x1x16x128xbf16> to vector<16x128xbf16>
    %21 = arith.extf %20 : vector<16x128xbf16> to vector<16x128xf32>
    %cst = arith.constant dense<0.000000e+00> : vector<16x128xf32>
    %22 = tpu.matmul %11, %9, %cst {dimension_numbers = #tpu.dot_dimension_numbers<[1], [0], [0], [1], [0, 0, 1, 1], [], []>} : vector<16x32xf32>, vector<32x128xf32>, vector<16x128xf32> -> vector<16x128xf32>
    %23 = arith.addf %21, %22 : vector<16x128xf32>
    %24 = arith.negf %23 : vector<16x128xf32>
    %25 = math.exp %24 : vector<16x128xf32>
    %cst_15 = arith.constant 1.000000e+00 : f32
    %26 = vector.broadcast %cst_15 : f32 to vector<16x128xf32>
    %27 = arith.addf %26, %25 : vector<16x128xf32>
    %28 = arith.divf %26, %27 : vector<16x128xf32>
    %29 = vector.extract_strided_slice %28 {offsets = [0, 0], sizes = [16, 32], strides = [1, 1]} : vector<16x128xf32> to vector<16x32xf32>
    %30 = vector.extract_strided_slice %28 {offsets = [0, 32], sizes = [16, 32], strides = [1, 1]} : vector<16x128xf32> to vector<16x32xf32>
    %31 = vector.extract_strided_slice %28 {offsets = [0, 96], sizes = [16, 32], strides = [1, 1]} : vector<16x128xf32> to vector<16x32xf32>
    %32 = vector.extract_strided_slice %23 {offsets = [0, 64], sizes = [16, 32], strides = [1, 1]} : vector<16x128xf32> to vector<16x32xf32>
    %33 = math.tanh %32 : vector<16x32xf32>
    %34 = arith.mulf %30, %12 : vector<16x32xf32>
    %35 = arith.mulf %29, %33 : vector<16x32xf32>
    %36 = arith.addf %34, %35 : vector<16x32xf32>
    %37 = math.tanh %36 : vector<16x32xf32>
    %38 = arith.mulf %31, %37 : vector<16x32xf32>
    %39 = vector.broadcast %17 : i32 to vector<16x1xi32>
    %40 = arith.cmpi sgt, %10, %39 : vector<16x1xi32>
    %41 = vector.shape_cast %40 : vector<16x1xi1> to vector<16x1xi1>
    %42 = vector.broadcast %41 : vector<16x1xi1> to vector<16x32xi1>
    %43 = arith.select %42, %38, %11 : vector<16x32xi1>, vector<16x32xf32>
    %44 = vector.shape_cast %40 : vector<16x1xi1> to vector<16x1xi1>
    %45 = vector.broadcast %44 : vector<16x1xi1> to vector<16x32xi1>
    %46 = arith.select %45, %36, %12 : vector<16x32xi1>, vector<16x32xf32>
    %cst_16 = arith.constant 0.000000e+00 : f32
    %47 = vector.shape_cast %40 : vector<16x1xi1> to vector<16x1xi1>
    %48 = vector.broadcast %47 : vector<16x1xi1> to vector<16x32xi1>
    %49 = vector.broadcast %cst_16 : f32 to vector<16x32xf32>
    %50 = arith.select %48, %38, %49 : vector<16x32xi1>, vector<16x32xf32>
    %c0_17 = arith.constant 0 : index
    %51 = arith.index_cast %16 : i32 to index
    %c0_18 = arith.constant 0 : index
    %c0_19 = arith.constant 0 : index
    %52 = vector.load %arg5[%c0_17, %51, %c0_18, %c0_19] : memref<1x8x16x32xf32, #tpu.memory_space<vmem>>, vector<1x1x16x32xf32>
    %53 = vector.shape_cast %52 : vector<1x1x16x32xf32> to vector<16x32xf32>
    %54 = vector.shape_cast %50 : vector<16x32xf32> to vector<1x1x16x32xf32>
    tpu.vector_store %arg5[%c0_17, %51, %c0_18, %c0_19], %54 {strides = array<i32>} : memref<1x8x16x32xf32, #tpu.memory_space<vmem>>, vector<1x1x16x32xf32>,
    %c1_i32 = arith.constant 1 : i32
    %c2_i32_20 = arith.constant 2 : i32
    %55 = arith.muli %c2_i32_20, %c1_i32 : i32
    %c7_i32_21 = arith.constant 7 : i32
    %56 = arith.subi %c7_i32_21, %55 : i32
    %57 = arith.muli %arg0, %56 : i32
    %58 = arith.addi %c1_i32, %57 : i32
    %59 = arith.addi %7, %58 : i32
    %c0_22 = arith.constant 0 : index
    %60 = arith.index_cast %58 : i32 to index
    %c0_23 = arith.constant 0 : index
    %c0_24 = arith.constant 0 : index
    %61 = vector.load %arg3[%c0_22, %60, %c0_23, %c0_24] : memref<1x8x16x128xbf16, #tpu.memory_space<vmem>>, vector<1x1x16x128xbf16>
    %62 = vector.shape_cast %61 : vector<1x1x16x128xbf16> to vector<16x128xbf16>
    %63 = arith.extf %62 : vector<16x128xbf16> to vector<16x128xf32>
    %cst_25 = arith.constant dense<0.000000e+00> : vector<16x128xf32>
    %64 = tpu.matmul %43, %9, %cst_25 {dimension_numbers = #tpu.dot_dimension_numbers<[1], [0], [0], [1], [0, 0, 1, 1], [], []>} : vector<16x32xf32>, vector<32x128xf32>, vector<16x128xf32> -> vector<16x128xf32>
    %65 = arith.addf %63, %64 : vector<16x128xf32>
    %66 = arith.negf %65 : vector<16x128xf32>
    %67 = math.exp %66 : vector<16x128xf32>
    %cst_26 = arith.constant 1.000000e+00 : f32
    %68 = vector.broadcast %cst_26 : f32 to vector<16x128xf32>
    %69 = arith.addf %68, %67 : vector<16x128xf32>
    %70 = arith.divf %68, %69 : vector<16x128xf32>
    %71 = vector.extract_strided_slice %70 {offsets = [0, 0], sizes = [16, 32], strides = [1, 1]} : vector<16x128xf32> to vector<16x32xf32>
    %72 = vector.extract_strided_slice %70 {offsets = [0, 32], sizes = [16, 32], strides = [1, 1]} : vector<16x128xf32> to vector<16x32xf32>
    %73 = vector.extract_strided_slice %70 {offsets = [0, 96], sizes = [16, 32], strides = [1, 1]} : vector<16x128xf32> to vector<16x32xf32>
    %74 = vector.extract_strided_slice %65 {offsets = [0, 64], sizes = [16, 32], strides = [1, 1]} : vector<16x128xf32> to vector<16x32xf32>
    %75 = math.tanh %74 : vector<16x32xf32>
    %76 = arith.mulf %72, %46 : vector<16x32xf32>
    %77 = arith.mulf %71, %75 : vector<16x32xf32>
    %78 = arith.addf %76, %77 : vector<16x32xf32>
    %79 = math.tanh %78 : vector<16x32xf32>
    %80 = arith.mulf %73, %79 : vector<16x32xf32>
    %81 = vector.broadcast %59 : i32 to vector<16x1xi32>
    %82 = arith.cmpi sgt, %10, %81 : vector<16x1xi32>
    %83 = vector.shape_cast %82 : vector<16x1xi1> to vector<16x1xi1>
    %84 = vector.broadcast %83 : vector<16x1xi1> to vector<16x32xi1>
    %85 = arith.select %84, %80, %43 : vector<16x32xi1>, vector<16x32xf32>
    %86 = vector.shape_cast %82 : vector<16x1xi1> to vector<16x1xi1>
    %87 = vector.broadcast %86 : vector<16x1xi1> to vector<16x32xi1>
    %88 = arith.select %87, %78, %46 : vector<16x32xi1>, vector<16x32xf32>
    %cst_27 = arith.constant 0.000000e+00 : f32
    %89 = vector.shape_cast %82 : vector<16x1xi1> to vector<16x1xi1>
    %90 = vector.broadcast %89 : vector<16x1xi1> to vector<16x32xi1>
    %91 = vector.broadcast %cst_27 : f32 to vector<16x32xf32>
    %92 = arith.select %90, %80, %91 : vector<16x32xi1>, vector<16x32xf32>
    %c0_28 = arith.constant 0 : index
    %93 = arith.index_cast %58 : i32 to index
    %c0_29 = arith.constant 0 : index
    %c0_30 = arith.constant 0 : index
    %94 = vector.load %arg5[%c0_28, %93, %c0_29, %c0_30] : memref<1x8x16x32xf32, #tpu.memory_space<vmem>>, vector<1x1x16x32xf32>
    %95 = vector.shape_cast %94 : vector<1x1x16x32xf32> to vector<16x32xf32>
    %96 = vector.shape_cast %92 : vector<16x32xf32> to vector<1x1x16x32xf32>
    tpu.vector_store %arg5[%c0_28, %93, %c0_29, %c0_30], %96 {strides = array<i32>} : memref<1x8x16x32xf32, #tpu.memory_space<vmem>>, vector<1x1x16x32xf32>,
    %c2_i32_31 = arith.constant 2 : i32
    %c2_i32_32 = arith.constant 2 : i32
    %97 = arith.muli %c2_i32_32, %c2_i32_31 : i32
    %c7_i32_33 = arith.constant 7 : i32
    %98 = arith.subi %c7_i32_33, %97 : i32
    %99 = arith.muli %arg0, %98 : i32
    %100 = arith.addi %c2_i32_31, %99 : i32
    %101 = arith.addi %7, %100 : i32
    %c0_34 = arith.constant 0 : index
    %102 = arith.index_cast %100 : i32 to index
    %c0_35 = arith.constant 0 : index
    %c0_36 = arith.constant 0 : index
    %103 = vector.load %arg3[%c0_34, %102, %c0_35, %c0_36] : memref<1x8x16x128xbf16, #tpu.memory_space<vmem>>, vector<1x1x16x128xbf16>
    %104 = vector.shape_cast %103 : vector<1x1x16x128xbf16> to vector<16x128xbf16>
    %105 = arith.extf %104 : vector<16x128xbf16> to vector<16x128xf32>
    %cst_37 = arith.constant dense<0.000000e+00> : vector<16x128xf32>
    %106 = tpu.matmul %85, %9, %cst_37 {dimension_numbers = #tpu.dot_dimension_numbers<[1], [0], [0], [1], [0, 0, 1, 1], [], []>} : vector<16x32xf32>, vector<32x128xf32>, vector<16x128xf32> -> vector<16x128xf32>
    %107 = arith.addf %105, %106 : vector<16x128xf32>
    %108 = arith.negf %107 : vector<16x128xf32>
    %109 = math.exp %108 : vector<16x128xf32>
    %cst_38 = arith.constant 1.000000e+00 : f32
    %110 = vector.broadcast %cst_38 : f32 to vector<16x128xf32>
    %111 = arith.addf %110, %109 : vector<16x128xf32>
    %112 = arith.divf %110, %111 : vector<16x128xf32>
    %113 = vector.extract_strided_slice %112 {offsets = [0, 0], sizes = [16, 32], strides = [1, 1]} : vector<16x128xf32> to vector<16x32xf32>
    %114 = vector.extract_strided_slice %112 {offsets = [0, 32], sizes = [16, 32], strides = [1, 1]} : vector<16x128xf32> to vector<16x32xf32>
    %115 = vector.extract_strided_slice %112 {offsets = [0, 96], sizes = [16, 32], strides = [1, 1]} : vector<16x128xf32> to vector<16x32xf32>
    %116 = vector.extract_strided_slice %107 {offsets = [0, 64], sizes = [16, 32], strides = [1, 1]} : vector<16x128xf32> to vector<16x32xf32>
    %117 = math.tanh %116 : vector<16x32xf32>
    %118 = arith.mulf %114, %88 : vector<16x32xf32>
    %119 = arith.mulf %113, %117 : vector<16x32xf32>
    %120 = arith.addf %118, %119 : vector<16x32xf32>
    %121 = math.tanh %120 : vector<16x32xf32>
    %122 = arith.mulf %115, %121 : vector<16x32xf32>
    %123 = vector.broadcast %101 : i32 to vector<16x1xi32>
    %124 = arith.cmpi sgt, %10, %123 : vector<16x1xi32>
    %125 = vector.shape_cast %124 : vector<16x1xi1> to vector<16x1xi1>
    %126 = vector.broadcast %125 : vector<16x1xi1> to vector<16x32xi1>
    %127 = arith.select %126, %122, %85 : vector<16x32xi1>, vector<16x32xf32>
    %128 = vector.shape_cast %124 : vector<16x1xi1> to vector<16x1xi1>
    %129 = vector.broadcast %128 : vector<16x1xi1> to vector<16x32xi1>
    %130 = arith.select %129, %120, %88 : vector<16x32xi1>, vector<16x32xf32>
    %cst_39 = arith.constant 0.000000e+00 : f32
    %131 = vector.shape_cast %124 : vector<16x1xi1> to vector<16x1xi1>
    %132 = vector.broadcast %131 : vector<16x1xi1> to vector<16x32xi1>
    %133 = vector.broadcast %cst_39 : f32 to vector<16x32xf32>
    %134 = arith.select %132, %122, %133 : vector<16x32xi1>, vector<16x32xf32>
    %c0_40 = arith.constant 0 : index
    %135 = arith.index_cast %100 : i32 to index
    %c0_41 = arith.constant 0 : index
    %c0_42 = arith.constant 0 : index
    %136 = vector.load %arg5[%c0_40, %135, %c0_41, %c0_42] : memref<1x8x16x32xf32, #tpu.memory_space<vmem>>, vector<1x1x16x32xf32>
    %137 = vector.shape_cast %136 : vector<1x1x16x32xf32> to vector<16x32xf32>
    %138 = vector.shape_cast %134 : vector<16x32xf32> to vector<1x1x16x32xf32>
    tpu.vector_store %arg5[%c0_40, %135, %c0_41, %c0_42], %138 {strides = array<i32>} : memref<1x8x16x32xf32, #tpu.memory_space<vmem>>, vector<1x1x16x32xf32>,
    %c3_i32 = arith.constant 3 : i32
    %c2_i32_43 = arith.constant 2 : i32
    %139 = arith.muli %c2_i32_43, %c3_i32 : i32
    %c7_i32_44 = arith.constant 7 : i32
    %140 = arith.subi %c7_i32_44, %139 : i32
    %141 = arith.muli %arg0, %140 : i32
    %142 = arith.addi %c3_i32, %141 : i32
    %143 = arith.addi %7, %142 : i32
    %c0_45 = arith.constant 0 : index
    %144 = arith.index_cast %142 : i32 to index
    %c0_46 = arith.constant 0 : index
    %c0_47 = arith.constant 0 : index
    %145 = vector.load %arg3[%c0_45, %144, %c0_46, %c0_47] : memref<1x8x16x128xbf16, #tpu.memory_space<vmem>>, vector<1x1x16x128xbf16>
    %146 = vector.shape_cast %145 : vector<1x1x16x128xbf16> to vector<16x128xbf16>
    %147 = arith.extf %146 : vector<16x128xbf16> to vector<16x128xf32>
    %cst_48 = arith.constant dense<0.000000e+00> : vector<16x128xf32>
    %148 = tpu.matmul %127, %9, %cst_48 {dimension_numbers = #tpu.dot_dimension_numbers<[1], [0], [0], [1], [0, 0, 1, 1], [], []>} : vector<16x32xf32>, vector<32x128xf32>, vector<16x128xf32> -> vector<16x128xf32>
    %149 = arith.addf %147, %148 : vector<16x128xf32>
    %150 = arith.negf %149 : vector<16x128xf32>
    %151 = math.exp %150 : vector<16x128xf32>
    %cst_49 = arith.constant 1.000000e+00 : f32
    %152 = vector.broadcast %cst_49 : f32 to vector<16x128xf32>
    %153 = arith.addf %152, %151 : vector<16x128xf32>
    %154 = arith.divf %152, %153 : vector<16x128xf32>
    %155 = vector.extract_strided_slice %154 {offsets = [0, 0], sizes = [16, 32], strides = [1, 1]} : vector<16x128xf32> to vector<16x32xf32>
    %156 = vector.extract_strided_slice %154 {offsets = [0, 32], sizes = [16, 32], strides = [1, 1]} : vector<16x128xf32> to vector<16x32xf32>
    %157 = vector.extract_strided_slice %154 {offsets = [0, 96], sizes = [16, 32], strides = [1, 1]} : vector<16x128xf32> to vector<16x32xf32>
    %158 = vector.extract_strided_slice %149 {offsets = [0, 64], sizes = [16, 32], strides = [1, 1]} : vector<16x128xf32> to vector<16x32xf32>
    %159 = math.tanh %158 : vector<16x32xf32>
    %160 = arith.mulf %156, %130 : vector<16x32xf32>
    %161 = arith.mulf %155, %159 : vector<16x32xf32>
    %162 = arith.addf %160, %161 : vector<16x32xf32>
    %163 = math.tanh %162 : vector<16x32xf32>
    %164 = arith.mulf %157, %163 : vector<16x32xf32>
    %165 = vector.broadcast %143 : i32 to vector<16x1xi32>
    %166 = arith.cmpi sgt, %10, %165 : vector<16x1xi32>
    %167 = vector.shape_cast %166 : vector<16x1xi1> to vector<16x1xi1>
    %168 = vector.broadcast %167 : vector<16x1xi1> to vector<16x32xi1>
    %169 = arith.select %168, %164, %127 : vector<16x32xi1>, vector<16x32xf32>
    %170 = vector.shape_cast %166 : vector<16x1xi1> to vector<16x1xi1>
    %171 = vector.broadcast %170 : vector<16x1xi1> to vector<16x32xi1>
    %172 = arith.select %171, %162, %130 : vector<16x32xi1>, vector<16x32xf32>
    %cst_50 = arith.constant 0.000000e+00 : f32
    %173 = vector.shape_cast %166 : vector<16x1xi1> to vector<16x1xi1>
    %174 = vector.broadcast %173 : vector<16x1xi1> to vector<16x32xi1>
    %175 = vector.broadcast %cst_50 : f32 to vector<16x32xf32>
    %176 = arith.select %174, %164, %175 : vector<16x32xi1>, vector<16x32xf32>
    %c0_51 = arith.constant 0 : index
    %177 = arith.index_cast %142 : i32 to index
    %c0_52 = arith.constant 0 : index
    %c0_53 = arith.constant 0 : index
    %178 = vector.load %arg5[%c0_51, %177, %c0_52, %c0_53] : memref<1x8x16x32xf32, #tpu.memory_space<vmem>>, vector<1x1x16x32xf32>
    %179 = vector.shape_cast %178 : vector<1x1x16x32xf32> to vector<16x32xf32>
    %180 = vector.shape_cast %176 : vector<16x32xf32> to vector<1x1x16x32xf32>
    tpu.vector_store %arg5[%c0_51, %177, %c0_52, %c0_53], %180 {strides = array<i32>} : memref<1x8x16x32xf32, #tpu.memory_space<vmem>>, vector<1x1x16x32xf32>,
    %c4_i32 = arith.constant 4 : i32
    %c2_i32_54 = arith.constant 2 : i32
    %181 = arith.muli %c2_i32_54, %c4_i32 : i32
    %c7_i32_55 = arith.constant 7 : i32
    %182 = arith.subi %c7_i32_55, %181 : i32
    %183 = arith.muli %arg0, %182 : i32
    %184 = arith.addi %c4_i32, %183 : i32
    %185 = arith.addi %7, %184 : i32
    %c0_56 = arith.constant 0 : index
    %186 = arith.index_cast %184 : i32 to index
    %c0_57 = arith.constant 0 : index
    %c0_58 = arith.constant 0 : index
    %187 = vector.load %arg3[%c0_56, %186, %c0_57, %c0_58] : memref<1x8x16x128xbf16, #tpu.memory_space<vmem>>, vector<1x1x16x128xbf16>
    %188 = vector.shape_cast %187 : vector<1x1x16x128xbf16> to vector<16x128xbf16>
    %189 = arith.extf %188 : vector<16x128xbf16> to vector<16x128xf32>
    %cst_59 = arith.constant dense<0.000000e+00> : vector<16x128xf32>
    %190 = tpu.matmul %169, %9, %cst_59 {dimension_numbers = #tpu.dot_dimension_numbers<[1], [0], [0], [1], [0, 0, 1, 1], [], []>} : vector<16x32xf32>, vector<32x128xf32>, vector<16x128xf32> -> vector<16x128xf32>
    %191 = arith.addf %189, %190 : vector<16x128xf32>
    %192 = arith.negf %191 : vector<16x128xf32>
    %193 = math.exp %192 : vector<16x128xf32>
    %cst_60 = arith.constant 1.000000e+00 : f32
    %194 = vector.broadcast %cst_60 : f32 to vector<16x128xf32>
    %195 = arith.addf %194, %193 : vector<16x128xf32>
    %196 = arith.divf %194, %195 : vector<16x128xf32>
    %197 = vector.extract_strided_slice %196 {offsets = [0, 0], sizes = [16, 32], strides = [1, 1]} : vector<16x128xf32> to vector<16x32xf32>
    %198 = vector.extract_strided_slice %196 {offsets = [0, 32], sizes = [16, 32], strides = [1, 1]} : vector<16x128xf32> to vector<16x32xf32>
    %199 = vector.extract_strided_slice %196 {offsets = [0, 96], sizes = [16, 32], strides = [1, 1]} : vector<16x128xf32> to vector<16x32xf32>
    %200 = vector.extract_strided_slice %191 {offsets = [0, 64], sizes = [16, 32], strides = [1, 1]} : vector<16x128xf32> to vector<16x32xf32>
    %201 = math.tanh %200 : vector<16x32xf32>
    %202 = arith.mulf %198, %172 : vector<16x32xf32>
    %203 = arith.mulf %197, %201 : vector<16x32xf32>
    %204 = arith.addf %202, %203 : vector<16x32xf32>
    %205 = math.tanh %204 : vector<16x32xf32>
    %206 = arith.mulf %199, %205 : vector<16x32xf32>
    %207 = vector.broadcast %185 : i32 to vector<16x1xi32>
    %208 = arith.cmpi sgt, %10, %207 : vector<16x1xi32>
    %209 = vector.shape_cast %208 : vector<16x1xi1> to vector<16x1xi1>
    %210 = vector.broadcast %209 : vector<16x1xi1> to vector<16x32xi1>
    %211 = arith.select %210, %206, %169 : vector<16x32xi1>, vector<16x32xf32>
    %212 = vector.shape_cast %208 : vector<16x1xi1> to vector<16x1xi1>
    %213 = vector.broadcast %212 : vector<16x1xi1> to vector<16x32xi1>
    %214 = arith.select %213, %204, %172 : vector<16x32xi1>, vector<16x32xf32>
    %cst_61 = arith.constant 0.000000e+00 : f32
    %215 = vector.shape_cast %208 : vector<16x1xi1> to vector<16x1xi1>
    %216 = vector.broadcast %215 : vector<16x1xi1> to vector<16x32xi1>
    %217 = vector.broadcast %cst_61 : f32 to vector<16x32xf32>
    %218 = arith.select %216, %206, %217 : vector<16x32xi1>, vector<16x32xf32>
    %c0_62 = arith.constant 0 : index
    %219 = arith.index_cast %184 : i32 to index
    %c0_63 = arith.constant 0 : index
    %c0_64 = arith.constant 0 : index
    %220 = vector.load %arg5[%c0_62, %219, %c0_63, %c0_64] : memref<1x8x16x32xf32, #tpu.memory_space<vmem>>, vector<1x1x16x32xf32>
    %221 = vector.shape_cast %220 : vector<1x1x16x32xf32> to vector<16x32xf32>
    %222 = vector.shape_cast %218 : vector<16x32xf32> to vector<1x1x16x32xf32>
    tpu.vector_store %arg5[%c0_62, %219, %c0_63, %c0_64], %222 {strides = array<i32>} : memref<1x8x16x32xf32, #tpu.memory_space<vmem>>, vector<1x1x16x32xf32>,
    %c5_i32 = arith.constant 5 : i32
    %c2_i32_65 = arith.constant 2 : i32
    %223 = arith.muli %c2_i32_65, %c5_i32 : i32
    %c7_i32_66 = arith.constant 7 : i32
    %224 = arith.subi %c7_i32_66, %223 : i32
    %225 = arith.muli %arg0, %224 : i32
    %226 = arith.addi %c5_i32, %225 : i32
    %227 = arith.addi %7, %226 : i32
    %c0_67 = arith.constant 0 : index
    %228 = arith.index_cast %226 : i32 to index
    %c0_68 = arith.constant 0 : index
    %c0_69 = arith.constant 0 : index
    %229 = vector.load %arg3[%c0_67, %228, %c0_68, %c0_69] : memref<1x8x16x128xbf16, #tpu.memory_space<vmem>>, vector<1x1x16x128xbf16>
    %230 = vector.shape_cast %229 : vector<1x1x16x128xbf16> to vector<16x128xbf16>
    %231 = arith.extf %230 : vector<16x128xbf16> to vector<16x128xf32>
    %cst_70 = arith.constant dense<0.000000e+00> : vector<16x128xf32>
    %232 = tpu.matmul %211, %9, %cst_70 {dimension_numbers = #tpu.dot_dimension_numbers<[1], [0], [0], [1], [0, 0, 1, 1], [], []>} : vector<16x32xf32>, vector<32x128xf32>, vector<16x128xf32> -> vector<16x128xf32>
    %233 = arith.addf %231, %232 : vector<16x128xf32>
    %234 = arith.negf %233 : vector<16x128xf32>
    %235 = math.exp %234 : vector<16x128xf32>
    %cst_71 = arith.constant 1.000000e+00 : f32
    %236 = vector.broadcast %cst_71 : f32 to vector<16x128xf32>
    %237 = arith.addf %236, %235 : vector<16x128xf32>
    %238 = arith.divf %236, %237 : vector<16x128xf32>
    %239 = vector.extract_strided_slice %238 {offsets = [0, 0], sizes = [16, 32], strides = [1, 1]} : vector<16x128xf32> to vector<16x32xf32>
    %240 = vector.extract_strided_slice %238 {offsets = [0, 32], sizes = [16, 32], strides = [1, 1]} : vector<16x128xf32> to vector<16x32xf32>
    %241 = vector.extract_strided_slice %238 {offsets = [0, 96], sizes = [16, 32], strides = [1, 1]} : vector<16x128xf32> to vector<16x32xf32>
    %242 = vector.extract_strided_slice %233 {offsets = [0, 64], sizes = [16, 32], strides = [1, 1]} : vector<16x128xf32> to vector<16x32xf32>
    %243 = math.tanh %242 : vector<16x32xf32>
    %244 = arith.mulf %240, %214 : vector<16x32xf32>
    %245 = arith.mulf %239, %243 : vector<16x32xf32>
    %246 = arith.addf %244, %245 : vector<16x32xf32>
    %247 = math.tanh %246 : vector<16x32xf32>
    %248 = arith.mulf %241, %247 : vector<16x32xf32>
    %249 = vector.broadcast %227 : i32 to vector<16x1xi32>
    %250 = arith.cmpi sgt, %10, %249 : vector<16x1xi32>
    %251 = vector.shape_cast %250 : vector<16x1xi1> to vector<16x1xi1>
    %252 = vector.broadcast %251 : vector<16x1xi1> to vector<16x32xi1>
    %253 = arith.select %252, %248, %211 : vector<16x32xi1>, vector<16x32xf32>
    %254 = vector.shape_cast %250 : vector<16x1xi1> to vector<16x1xi1>
    %255 = vector.broadcast %254 : vector<16x1xi1> to vector<16x32xi1>
    %256 = arith.select %255, %246, %214 : vector<16x32xi1>, vector<16x32xf32>
    %cst_72 = arith.constant 0.000000e+00 : f32
    %257 = vector.shape_cast %250 : vector<16x1xi1> to vector<16x1xi1>
    %258 = vector.broadcast %257 : vector<16x1xi1> to vector<16x32xi1>
    %259 = vector.broadcast %cst_72 : f32 to vector<16x32xf32>
    %260 = arith.select %258, %248, %259 : vector<16x32xi1>, vector<16x32xf32>
    %c0_73 = arith.constant 0 : index
    %261 = arith.index_cast %226 : i32 to index
    %c0_74 = arith.constant 0 : index
    %c0_75 = arith.constant 0 : index
    %262 = vector.load %arg5[%c0_73, %261, %c0_74, %c0_75] : memref<1x8x16x32xf32, #tpu.memory_space<vmem>>, vector<1x1x16x32xf32>
    %263 = vector.shape_cast %262 : vector<1x1x16x32xf32> to vector<16x32xf32>
    %264 = vector.shape_cast %260 : vector<16x32xf32> to vector<1x1x16x32xf32>
    tpu.vector_store %arg5[%c0_73, %261, %c0_74, %c0_75], %264 {strides = array<i32>} : memref<1x8x16x32xf32, #tpu.memory_space<vmem>>, vector<1x1x16x32xf32>,
    %c6_i32 = arith.constant 6 : i32
    %c2_i32_76 = arith.constant 2 : i32
    %265 = arith.muli %c2_i32_76, %c6_i32 : i32
    %c7_i32_77 = arith.constant 7 : i32
    %266 = arith.subi %c7_i32_77, %265 : i32
    %267 = arith.muli %arg0, %266 : i32
    %268 = arith.addi %c6_i32, %267 : i32
    %269 = arith.addi %7, %268 : i32
    %c0_78 = arith.constant 0 : index
    %270 = arith.index_cast %268 : i32 to index
    %c0_79 = arith.constant 0 : index
    %c0_80 = arith.constant 0 : index
    %271 = vector.load %arg3[%c0_78, %270, %c0_79, %c0_80] : memref<1x8x16x128xbf16, #tpu.memory_space<vmem>>, vector<1x1x16x128xbf16>
    %272 = vector.shape_cast %271 : vector<1x1x16x128xbf16> to vector<16x128xbf16>
    %273 = arith.extf %272 : vector<16x128xbf16> to vector<16x128xf32>
    %cst_81 = arith.constant dense<0.000000e+00> : vector<16x128xf32>
    %274 = tpu.matmul %253, %9, %cst_81 {dimension_numbers = #tpu.dot_dimension_numbers<[1], [0], [0], [1], [0, 0, 1, 1], [], []>} : vector<16x32xf32>, vector<32x128xf32>, vector<16x128xf32> -> vector<16x128xf32>
    %275 = arith.addf %273, %274 : vector<16x128xf32>
    %276 = arith.negf %275 : vector<16x128xf32>
    %277 = math.exp %276 : vector<16x128xf32>
    %cst_82 = arith.constant 1.000000e+00 : f32
    %278 = vector.broadcast %cst_82 : f32 to vector<16x128xf32>
    %279 = arith.addf %278, %277 : vector<16x128xf32>
    %280 = arith.divf %278, %279 : vector<16x128xf32>
    %281 = vector.extract_strided_slice %280 {offsets = [0, 0], sizes = [16, 32], strides = [1, 1]} : vector<16x128xf32> to vector<16x32xf32>
    %282 = vector.extract_strided_slice %280 {offsets = [0, 32], sizes = [16, 32], strides = [1, 1]} : vector<16x128xf32> to vector<16x32xf32>
    %283 = vector.extract_strided_slice %280 {offsets = [0, 96], sizes = [16, 32], strides = [1, 1]} : vector<16x128xf32> to vector<16x32xf32>
    %284 = vector.extract_strided_slice %275 {offsets = [0, 64], sizes = [16, 32], strides = [1, 1]} : vector<16x128xf32> to vector<16x32xf32>
    %285 = math.tanh %284 : vector<16x32xf32>
    %286 = arith.mulf %282, %256 : vector<16x32xf32>
    %287 = arith.mulf %281, %285 : vector<16x32xf32>
    %288 = arith.addf %286, %287 : vector<16x32xf32>
    %289 = math.tanh %288 : vector<16x32xf32>
    %290 = arith.mulf %283, %289 : vector<16x32xf32>
    %291 = vector.broadcast %269 : i32 to vector<16x1xi32>
    %292 = arith.cmpi sgt, %10, %291 : vector<16x1xi32>
    %293 = vector.shape_cast %292 : vector<16x1xi1> to vector<16x1xi1>
    %294 = vector.broadcast %293 : vector<16x1xi1> to vector<16x32xi1>
    %295 = arith.select %294, %290, %253 : vector<16x32xi1>, vector<16x32xf32>
    %296 = vector.shape_cast %292 : vector<16x1xi1> to vector<16x1xi1>
    %297 = vector.broadcast %296 : vector<16x1xi1> to vector<16x32xi1>
    %298 = arith.select %297, %288, %256 : vector<16x32xi1>, vector<16x32xf32>
    %cst_83 = arith.constant 0.000000e+00 : f32
    %299 = vector.shape_cast %292 : vector<16x1xi1> to vector<16x1xi1>
    %300 = vector.broadcast %299 : vector<16x1xi1> to vector<16x32xi1>
    %301 = vector.broadcast %cst_83 : f32 to vector<16x32xf32>
    %302 = arith.select %300, %290, %301 : vector<16x32xi1>, vector<16x32xf32>
    %c0_84 = arith.constant 0 : index
    %303 = arith.index_cast %268 : i32 to index
    %c0_85 = arith.constant 0 : index
    %c0_86 = arith.constant 0 : index
    %304 = vector.load %arg5[%c0_84, %303, %c0_85, %c0_86] : memref<1x8x16x32xf32, #tpu.memory_space<vmem>>, vector<1x1x16x32xf32>
    %305 = vector.shape_cast %304 : vector<1x1x16x32xf32> to vector<16x32xf32>
    %306 = vector.shape_cast %302 : vector<16x32xf32> to vector<1x1x16x32xf32>
    tpu.vector_store %arg5[%c0_84, %303, %c0_85, %c0_86], %306 {strides = array<i32>} : memref<1x8x16x32xf32, #tpu.memory_space<vmem>>, vector<1x1x16x32xf32>,
    %c7_i32_87 = arith.constant 7 : i32
    %c2_i32_88 = arith.constant 2 : i32
    %307 = arith.muli %c2_i32_88, %c7_i32_87 : i32
    %c7_i32_89 = arith.constant 7 : i32
    %308 = arith.subi %c7_i32_89, %307 : i32
    %309 = arith.muli %arg0, %308 : i32
    %310 = arith.addi %c7_i32_87, %309 : i32
    %311 = arith.addi %7, %310 : i32
    %c0_90 = arith.constant 0 : index
    %312 = arith.index_cast %310 : i32 to index
    %c0_91 = arith.constant 0 : index
    %c0_92 = arith.constant 0 : index
    %313 = vector.load %arg3[%c0_90, %312, %c0_91, %c0_92] : memref<1x8x16x128xbf16, #tpu.memory_space<vmem>>, vector<1x1x16x128xbf16>
    %314 = vector.shape_cast %313 : vector<1x1x16x128xbf16> to vector<16x128xbf16>
    %315 = arith.extf %314 : vector<16x128xbf16> to vector<16x128xf32>
    %cst_93 = arith.constant dense<0.000000e+00> : vector<16x128xf32>
    %316 = tpu.matmul %295, %9, %cst_93 {dimension_numbers = #tpu.dot_dimension_numbers<[1], [0], [0], [1], [0, 0, 1, 1], [], []>} : vector<16x32xf32>, vector<32x128xf32>, vector<16x128xf32> -> vector<16x128xf32>
    %317 = arith.addf %315, %316 : vector<16x128xf32>
    %318 = arith.negf %317 : vector<16x128xf32>
    %319 = math.exp %318 : vector<16x128xf32>
    %cst_94 = arith.constant 1.000000e+00 : f32
    %320 = vector.broadcast %cst_94 : f32 to vector<16x128xf32>
    %321 = arith.addf %320, %319 : vector<16x128xf32>
    %322 = arith.divf %320, %321 : vector<16x128xf32>
    %323 = vector.extract_strided_slice %322 {offsets = [0, 0], sizes = [16, 32], strides = [1, 1]} : vector<16x128xf32> to vector<16x32xf32>
    %324 = vector.extract_strided_slice %322 {offsets = [0, 32], sizes = [16, 32], strides = [1, 1]} : vector<16x128xf32> to vector<16x32xf32>
    %325 = vector.extract_strided_slice %322 {offsets = [0, 96], sizes = [16, 32], strides = [1, 1]} : vector<16x128xf32> to vector<16x32xf32>
    %326 = vector.extract_strided_slice %317 {offsets = [0, 64], sizes = [16, 32], strides = [1, 1]} : vector<16x128xf32> to vector<16x32xf32>
    %327 = math.tanh %326 : vector<16x32xf32>
    %328 = arith.mulf %324, %298 : vector<16x32xf32>
    %329 = arith.mulf %323, %327 : vector<16x32xf32>
    %330 = arith.addf %328, %329 : vector<16x32xf32>
    %331 = math.tanh %330 : vector<16x32xf32>
    %332 = arith.mulf %325, %331 : vector<16x32xf32>
    %333 = vector.broadcast %311 : i32 to vector<16x1xi32>
    %334 = arith.cmpi sgt, %10, %333 : vector<16x1xi32>
    %335 = vector.shape_cast %334 : vector<16x1xi1> to vector<16x1xi1>
    %336 = vector.broadcast %335 : vector<16x1xi1> to vector<16x32xi1>
    %337 = arith.select %336, %332, %295 : vector<16x32xi1>, vector<16x32xf32>
    %338 = vector.shape_cast %334 : vector<16x1xi1> to vector<16x1xi1>
    %339 = vector.broadcast %338 : vector<16x1xi1> to vector<16x32xi1>
    %340 = arith.select %339, %330, %298 : vector<16x32xi1>, vector<16x32xf32>
    %cst_95 = arith.constant 0.000000e+00 : f32
    %341 = vector.shape_cast %334 : vector<16x1xi1> to vector<16x1xi1>
    %342 = vector.broadcast %341 : vector<16x1xi1> to vector<16x32xi1>
    %343 = vector.broadcast %cst_95 : f32 to vector<16x32xf32>
    %344 = arith.select %342, %332, %343 : vector<16x32xi1>, vector<16x32xf32>
    %c0_96 = arith.constant 0 : index
    %345 = arith.index_cast %310 : i32 to index
    %c0_97 = arith.constant 0 : index
    %c0_98 = arith.constant 0 : index
    %346 = vector.load %arg5[%c0_96, %345, %c0_97, %c0_98] : memref<1x8x16x32xf32, #tpu.memory_space<vmem>>, vector<1x1x16x32xf32>
    %347 = vector.shape_cast %346 : vector<1x1x16x32xf32> to vector<16x32xf32>
    %348 = vector.shape_cast %344 : vector<16x32xf32> to vector<1x1x16x32xf32>
    tpu.vector_store %arg5[%c0_96, %345, %c0_97, %c0_98], %348 {strides = array<i32>} : memref<1x8x16x32xf32, #tpu.memory_space<vmem>>, vector<1x1x16x32xf32>,
    %c8_i32_99 = arith.constant 8 : i32
    %c0_100 = arith.constant 0 : index
    %c0_101 = arith.constant 0 : index
    %349 = vector.load %arg7[%c0_100, %c0_101] : memref<16x32xf32, #tpu.memory_space<vmem>>, vector<16x32xf32>
    tpu.vector_store %arg7[%c0_100, %c0_101], %337 {strides = array<i32>} : memref<16x32xf32, #tpu.memory_space<vmem>>, vector<16x32xf32>,
    %c0_102 = arith.constant 0 : index
    %c0_103 = arith.constant 0 : index
    %350 = vector.load %arg8[%c0_102, %c0_103] : memref<16x32xf32, #tpu.memory_space<vmem>>, vector<16x32xf32>
    tpu.vector_store %arg8[%c0_102, %c0_103], %340 {strides = array<i32>} : memref<16x32xf32, #tpu.memory_space<vmem>>, vector<16x32xf32>,
    %c0_i32_104 = arith.constant 0 : i32
    %351 = arith.cmpi eq, %arg1, %c0_i32_104 : i32
    %352 = arith.extui %351 : i1 to i32
    %c0_i32_105 = arith.constant 0 : i32
    %353 = arith.cmpi ne, %352, %c0_i32_105 : i32
    scf.if %353 {
      %c0_106 = arith.constant 0 : index
      %c0_107 = arith.constant 0 : index
      %c0_108 = arith.constant 0 : index
      %354 = vector.load %arg6[%c0_106, %c0_107, %c0_108] : memref<1x16x32xf32, #tpu.memory_space<vmem>>, vector<1x16x32xf32>
      %355 = vector.shape_cast %354 : vector<1x16x32xf32> to vector<16x32xf32>
      %356 = vector.shape_cast %337 : vector<16x32xf32> to vector<1x16x32xf32>
      tpu.vector_store %arg6[%c0_106, %c0_107, %c0_108], %356 {strides = array<i32>} : memref<1x16x32xf32, #tpu.memory_space<vmem>>, vector<1x16x32xf32>,
    } else {
    }
    return
  }
  func.func @transform_0(%arg0: i32, %arg1: i32) -> (i32, i32) {
    %c0_i32 = arith.constant 0 : i32
    %c0_i32_0 = arith.constant 0 : i32
    %c0_i32_1 = arith.constant 0 : i32
    return %c0_i32, %c0_i32_0 : i32, i32
  }
  func.func @transform_1(%arg0: i32, %arg1: i32) -> (i32, i32, i32, i32) {
    %c2_i32 = arith.constant 2 : i32
    %0 = arith.muli %c2_i32, %arg1 : i32
    %c0_i32 = arith.constant 0 : i32
    %1 = arith.subi %c0_i32, %0 : i32
    %2 = arith.muli %arg0, %1 : i32
    %3 = arith.addi %arg1, %2 : i32
    %c0_i32_0 = arith.constant 0 : i32
    %c0_i32_1 = arith.constant 0 : i32
    %c0_i32_2 = arith.constant 0 : i32
    return %arg0, %3, %c0_i32_0, %c0_i32_1 : i32, i32, i32, i32
  }
  func.func @transform_2(%arg0: i32, %arg1: i32) -> (i32, i32, i32) {
    %c0_i32 = arith.constant 0 : i32
    %c0_i32_0 = arith.constant 0 : i32
    %c0_i32_1 = arith.constant 0 : i32
    return %arg0, %c0_i32, %c0_i32_0 : i32, i32, i32
  }
  func.func @transform_3(%arg0: i32, %arg1: i32) -> (i32, i32, i32, i32) {
    %c2_i32 = arith.constant 2 : i32
    %0 = arith.muli %c2_i32, %arg1 : i32
    %c0_i32 = arith.constant 0 : i32
    %1 = arith.subi %c0_i32, %0 : i32
    %2 = arith.muli %arg0, %1 : i32
    %3 = arith.addi %arg1, %2 : i32
    %c0_i32_0 = arith.constant 0 : i32
    %c0_i32_1 = arith.constant 0 : i32
    %c0_i32_2 = arith.constant 0 : i32
    return %arg0, %3, %c0_i32_0, %c0_i32_1 : i32, i32, i32, i32
  }
  func.func @transform_4(%arg0: i32, %arg1: i32) -> (i32, i32, i32) {
    %c0_i32 = arith.constant 0 : i32
    %c0_i32_0 = arith.constant 0 : i32
    %c0_i32_1 = arith.constant 0 : i32
    return %arg0, %c0_i32, %c0_i32_0 : i32, i32, i32
  }
}

</mosaic_0001>

<bundles_post_ra>
// kernel: tpu_custom_call.1
= control target key start
LH: loop header
LB: loop body
LE: loop exit
PB: predicated region body
PF: predicated region fallthrough
CT: control target
= control target key end

     0   :  { %10 = vsyncpa [#allocation5], 0  ;;  %s3719_s0 = inlined_call_operand.vmem [shape: s32[16,1], index: 0, kind: input, shape index: {}]   ;;  %s3720_s1 = inlined_call_operand.hbm [shape: bf16[2,8,16,128], index: 1, kind: input, shape index: {}]   ;;  %s3721_s2 = inlined_call_operand.hbm [shape: f32[2,32,128], index: 2, kind: input, shape index: {}]   ;;  %s3722_s3 = inlined_call_operand.hbm [shape: f32[2,8,16,32], index: 3, kind: output, shape index: {0}]   ;;  %s3723_s4 = inlined_call_operand.hbm [shape: f32[2,16,32], index: 4, kind: output, shape index: {1}]  }
   0x1   :  { %12 = vsyncpa [#allocation5 + $0x1], 0 }
   0x2   :  { %13 = vsyncpa [#allocation8], 0 }
   0x3   :  { %15 = vsyncpa [#allocation8 + $0x1], 0 }
   0x4   :  { %16 = vsyncpa [#allocation6], 0 }
   0x5   :  { %18 = vsyncpa [#allocation6 + $0x1], 0 }
   0x6   :  { %19 = vsyncpa [#allocation11], 0 }
   0x7   :  { %21 = vsyncpa [#allocation11 + $0x1], 0  ;;  %s2797_s15 = smov 0   ;;  %s2799_s16 = smov 0  }
   0x8   :  { %s2801_s17 = smov 0   ;;  %s2803_s18 = smov 0  }
   0x9   :  { %s2805_s19 = smov 0   ;;  %s2807_s20 = smov 0  }
   0xa LB: > { %s2021_s21 = sadd.s32 4294967295, %s2755_s20   ;;  %s2022_s22 = sadd.s32 4294967294, %s2755_s20   ;;  %s2755_s20 = sphi %s2807_s20, %s27_s20   ;;  %s2751_s19 = sphi %s2805_s19, %s3764_s19   ;;  %s2747_s18 = sphi %s2803_s18, %s3763_s18   ;;  %s2743_s17 = sphi %s2801_s17, %s3762_s17   ;;  %s2739_s16 = sphi %s2799_s16, %s3761_s16   ;;  %s2735_s15 = sphi %s2797_s15, %s3760_s15  }
   0xb   : > { %s39_s23 = sadd.s32 1, %s2751_s19  ;;  %s77_s24 = sadd.s32 1, %s2743_s17 }
   0xc   : > { %p41_p0 = scmp.ge.s32.totalorder %s39_s23, 2  ;;  %p84_p1 = scmp.ne.s32.totalorder %s2743_s17, %s2739_s16 }
   0xd   : > { %p85_p2 = scmp.eq.s32.totalorder %s2755_s20, 0  ;;  %p90_p3 = scmp.ne.s32.totalorder %s2739_s16, %s2735_s15 }
   0xe   : > { %s3766_s23 = smov (%p41_p0, %s39_s23), 0  ;;  %p91_p5 = scmp.eq.s32.totalorder %s2021_s21, 0 }
   0xf   : > { %p2838_p4 = por %p85_p2, %p84_p1  ;;  %s72_s26 = ssub.s32 %s2751_s19, %s3766_s23 }
  0x10   : > { %p150_p6 = scmp.eq.s32.totalorder %s2021_s21, 1  ;;  %p75_p7 = scmp.eq.s32.totalorder %s72_s26, 0 }
  0x11   : > { %p2844_p8 = por %p91_p5, %p90_p3  ;;  %p156_p10 = scmp.eq.s32.totalorder %s2022_s22, 1 }
  0x12   : > { %p2848_p9 = por %p150_p6, %p84_p1  ;;  %p2384_p13 = scmp.lt.s32.totalorder %s2755_s20, 2 }
  0x13   : > { %s3728_s27 = scalar_select %p2844_p8, 1, 0 }
  0x14   : > { %s3729_s28 = scalar_select %p2848_p9, 1, 0 }
  0x15   : > { %s2853_s29 = scalar_select %p75_p7, %s2743_s17, %s77_s24  }
  0x16   : > { %p2855_p11 = por %p156_p10, %p90_p3  ;;  %s2862_s5 = sand.u32 1, %s2743_s17  }
  0x17   : > { %s2025_s6 = sshll.u32 %s2862_s5, 6  ;;  %s2118_s7 = sshll.u32 %s2751_s19, 10 }
  0x18   : > { %s3730_s30 = scalar_select %p2855_p11, 1, 0 }
  0x19   : > { %s2869_s10 = scalar_lea.hbm %s3720_s1, %s2118_s7  ;;  %s209_s11 = scalar_lea.vmem [#allocation4], %s2025_s6 }
  0x1a   : > { %s223_s12 = sshll.u32 %s209_s11, 4  ;;  %p2875_p0 = pnand %p2384_p13, %p2838_p4  ;;  %s2871_s12 = int_to_ptr.vmem [resolvable:$true] %s223_s12 }
  0x1b   : > { %s206_s14 = scalar_lea.sflag [#allocation5], %s2862_s5  ;;  %s2577_s21 = scalar_lea.hbm %s2869_s10, 1024 }
  0x1c   : > { %p2578_p2 = scmp.ne.s32.totalorder %s2869_s10, %s2577_s21  ;;  %p2579_p3 = pneg %p2875_p0 }
  0x1d   : > { %s2582_s25 = scalar_lea.hbm %s3720_s1, 2048  ;;  %p2583_p4 = scmp.lt.u32.totalorder %s2869_s10, %s3720_s1 }
  0x1e   : > { %p2580_p5 = pnand %p2579_p3, %p2578_p2  ;;  %p2584_p7 = scmp.lt.u32.totalorder %s2582_s25, %s2577_s21 }
  0x1f   : > { %p2586_p13 = scmp.lt.u32.totalorder %s2577_s21, %s2869_s10 }
  0x20   : > { %p2581_p6 = pneg %p2580_p5  ;;  %p2585_p10 = por %p2584_p7, %p2583_p4 }
  0x22   : > { %p2587_p12 = por %p2586_p13, %p2585_p10 }
  0x24   : > { %p2588_p1 = pnand %p2587_p12, %p2581_p6 }
  0x26   : > { %2591 = shalt.err (!%p2588_p1)
}
  0x27   : > { %s2592_s7 = scalar_lea.vmem %s2871_s12, 1024  ;;  %s2757_s8 = smov [#allocation4]  }
  0x28   : > { %p2593_p2 = scmp.ne.s32.totalorder %s2871_s12, %s2592_s7  ;;  %s2597_s9 = sshll.u32 %s2757_s8, 4  ;;  %s2598_s9 = int_to_ptr.vmem [resolvable:$false] %s2597_s9 }
  0x29   : > { %s2599_s11 = scalar_lea.vmem %s2598_s9, 2048  ;;  %p2600_p9 = scmp.lt.s32.totalorder %s2871_s12, %s2598_s9 }
  0x2a   : > { %p2595_p5 = pnand %p2593_p2, %p2579_p3  ;;  %p2601_p4 = scmp.lt.s32.totalorder %s2599_s11, %s2592_s7 }
  0x2c   : > { %p2596_p11 = pneg %p2595_p5  ;;  %p2602_p7 = por %p2601_p4, %p2600_p9 }
  0x2e   : > { %p2603_p10 = pnand %p2602_p7, %p2596_p11 }
  0x30   : > { %2606 = shalt.err (!%p2603_p10)
}
  0x31   : > { %s2758_s21 = smov 64   ;;  %s2759_s22 = smov 4  }
  0x32   : > { %2373 = dma.hbm_to_vmem [thread:$0]  (!%p2875_p0), %s2869_s10, 1024, %s2871_s12, %s206_s14, %s2758_s21, %s2758_s21, %s2759_s22  }
  0x33   : > { %p252_p12 = scmp.lt.s32.totalorder %s2755_s20, 3  ;;  %s2028_s24 = sshll.u32 %s2862_s5, 5 }
  0x34   : > { %s2119_s25 = sshll.u32 %s2751_s19, 9  ;;  %p3732_p9 = scmp.ge.s32.totalorder %s2755_s20, 1 }
  0x35   : > { %s2920_s8 = scalar_lea.hbm %s3721_s2, %s2119_s25  ;;  %s237_s9 = scalar_lea.vmem [#allocation7], %s2028_s24 }
  0x36   : > { %p2913_p11 = pnand %p3732_p9, %p252_p12  ;;  %s244_s11 = sshll.u32 %s237_s9, 4  ;;  %s2922_s11 = int_to_ptr.vmem [resolvable:$true] %s244_s11 }
  0x37   : > { %s234_s10 = scalar_lea.sflag [#allocation8], %s2862_s5  ;;  %s2607_s12 = scalar_lea.hbm %s2920_s8, 512 }
  0x38   : > { %p2608_p1 = scmp.ne.s32.totalorder %s2920_s8, %s2607_s12  ;;  %s2612_s22 = scalar_lea.hbm %s3721_s2, 1024 }
  0x39   : > { %p2613_p2 = scmp.lt.u32.totalorder %s2920_s8, %s3721_s2  ;;  %p2614_p5 = scmp.lt.u32.totalorder %s2612_s22, %s2607_s12 }
  0x3a   : > { %p2610_p6 = pnand %p2608_p1, %p2579_p3  ;;  %p2616_p7 = scmp.lt.u32.totalorder %s2607_s12, %s2920_s8 }
  0x3b   : > { %p2615_p4 = por %p2614_p5, %p2613_p2 }
  0x3c   : > { %p2611_p13 = pneg %p2610_p6 }
  0x3d   : > { %p2617_p10 = por %p2616_p7, %p2615_p4 }
  0x3f   : > { %p2618_p12 = pnand %p2617_p10, %p2611_p13 }
  0x41   : > { %2621 = shalt.err (!%p2618_p12)
}
  0x42   : > { %s2622_s24 = scalar_lea.vmem %s2922_s11, 512  ;;  %s2760_s7 = smov [#allocation7]  }
  0x43   : > { %p2623_p9 = scmp.ne.s32.totalorder %s2922_s11, %s2622_s24  ;;  %s2627_s9 = sshll.u32 %s2760_s7, 4  ;;  %s2628_s9 = int_to_ptr.vmem [resolvable:$false] %s2627_s9 }
  0x44   : > { %s2629_s14 = scalar_lea.vmem %s2628_s9, 1024  ;;  %p2630_p8 = scmp.lt.s32.totalorder %s2922_s11, %s2628_s9 }
  0x45   : > { %p2625_p1 = pnand %p2623_p9, %p2579_p3  ;;  %p2631_p2 = scmp.lt.s32.totalorder %s2629_s14, %s2622_s24 }
  0x47   : > { %p2626_p6 = pneg %p2625_p1  ;;  %p2632_p5 = por %p2631_p2, %p2630_p8 }
  0x49   : > { %p2633_p4 = pnand %p2632_p5, %p2626_p6 }
  0x4b   : > { %2636 = shalt.err (!%p2633_p4)
}
  0x4c   : > { %s2761_s12 = smov 128   ;;  %s2762_s21 = smov 8  }
  0x4d   : > { %2376 = dma.hbm_to_vmem [thread:$0]  (!%p2875_p0), %s2920_s8, 512, %s2922_s11, %s234_s10, %s2761_s12, %s2761_s12, %s2762_s21  }
  0x4e   : > { %256 = sbr.rel (%p2913_p11) target bundleno = 5784 (0x1698), region = 32  ;;  %s2953_s22 = sand.u32 (!%p2913_p11), 1, %s2739_s16  }
  0x4f   : > { %s2032_s25 = sshll.u32 (!%p2913_p11), %s2953_s22, 6  ;;  %s259_s6 = scalar_lea.sflag (!%p2913_p11), [#allocation5], %s2953_s22 }
  0x50   : > { %s2957_s24 = scalar_lea.vmem (!%p2913_p11), [#allocation4], %s2032_s25  ;;  %p3734_p8 = scmp.ne.s32.totalorder (!%p2913_p11), %s3728_s27, 0 }
  0x55   : > { %2718 = dma.done.wait (%p3734_p8), %s259_s6, 1024  }
  0x56   : > { %2720 = vsyncadd (%p3734_p8), %s259_s6, 4294966272  ;;  %s2033_s5 = sshll.u32 %s2953_s22, 5  ;;  %s268_s13 = scalar_lea.sflag [#allocation8], %s2953_s22 }
  0x57   : > { %s271_s26 = scalar_lea.vmem [#allocation7], %s2033_s5 }
  0x58   : > { %2722 = dma.done.wait (%p3734_p8), %s268_s13, 512  }
  0x59   : > { %2724 = vsyncadd (%p3734_p8), %s268_s13, 4294966784  ;;  %vm3726_vm0 = vcmask 261120   ;;  %v2763_v0 = vmov 0.0   ;;  %v330_v1 = vld [vmem:[%s271_s26] sm:$0xff]  ;;  %v331_v2 = vld [vmem:[%s271_s26 + $0x8] sm:$0xff]  ;;  %s2764_s27 = smov 32  }
  0x5a   : > { %321 = vst.msk [vmem:[#allocation2] sm:$0xff] %vm3726_vm0, %v2763_v0  ;;  %322 = vst.msk [vmem:[#allocation2 + $0x8] sm:$0xff] %vm3726_vm0, %v2763_v0  ;;  %v332_v3 = vld [vmem:[%s271_s26 + $0x10] sm:$0xff]  ;;  %v2973_v4 = vpack.c.bf16 %v331_v2, %v330_v1  ;;  %v333_v5 = vld [vmem:[%s271_s26 + $0x18] sm:$0xff]  ;;  %s2120_s8 = smul.u32 56, %s2747_s18  ;;  %v2765_v18 = vmov 0  }
  0x5b   : > { %323 = vst.msk [vmem:[#allocation3] sm:$0xff] %vm3726_vm0, %v2763_v0  ;;  %324 = vst.msk [vmem:[#allocation3 + $0x8] sm:$0xff] %vm3726_vm0, %v2763_v0  ;;  %v2977_v7 = vpack.c.bf16 %v333_v5, %v332_v3  ;;  %2445 = vset.pattern.permute.xlu0 %v2765_v18  ;;  %2446 = vset.pattern.permute.xlu1 %v2765_v18  ;;  %s2766_s10 = smov 64   ;;  %s340_s7 = smul.u32 7, %s2747_s18  ;;  %v3011_v27 = vld [vmem:[%s3719_s0] sm:$0xff]  ;;  %v3017_v32 = vld [vmem:[%s3719_s0 + $0x8] sm:$0xff] }
  0x5c   : > { %2299 = vmatprep.subr.bf16.mxu0 %v2973_v4  ;;  %2307 = vmatprep.subr.bf16.mxu1 %v2973_v4  ;;  %s344_s11 = scalar_lea.vmem %s2957_s24, %s2120_s8 [#allocation4]  ;;  %s2767_s25 = smov 96  }
  0x5d   : > { %2301 = vmatpush3.bf16.msra.mxu0 %v2973_v4  ;;  %2309 = vmatpush3.bf16.msra.mxu1 %v2973_v4  ;;  %v2125_v11 = vld [vmem:[%s344_s11] sm:$0xff]   ;;  %v489_v28 = vstv %s340_s7  ;;  %s2043_s6 = smul.u32 40, %s2747_s18  ;;  %s2063_s14 = sshll.u32 %s2747_s18, 3 }
  0x5e   : > { %2303 = vmatprep.subr.bf16.mxu0 %v2977_v7  ;;  %2311 = vmatprep.subr.bf16.mxu1 %v2977_v7  ;;  %v2126_v12 = vunpack.c.l.bf16 %v2125_v11  ;;  %v2127_v13 = vunpack.c.h.bf16 %v2125_v11  ;;  %vm490_vm1 = vcmp.gt.s32.totalorder %v3011_v27, %v489_v28  ;;  %vm491_vm2 = vcmp.gt.s32.totalorder %v3017_v32, %v489_v28  ;;  %s526_s13 = smul.u32 5, %s2747_s18  ;;  %s1918_s12 = scalar_lea.vmem %s2957_s24, %s2063_s14 [#allocation4] }
  0x5f   : > { %v492_v35 = vsel %vm490_vm1, 1, %v2765_v18  ;;  %v493_v37 = vsel %vm491_vm2, 1, %v2765_v18  ;;  %s1903_s5 = scalar_lea.vmem %s2957_s24, %s2043_s6 [#allocation4]  ;;  %s2053_s8 = smul.u32 24, %s2747_s18 }
  0x60   : > { %v2156_v60 = vld [vmem:[%s1903_s5 + $0x8] sm:$0xff]   ;;  %s527_s26 = sadd.s32 1, %s526_s13  ;;  %s702_s7 = smul.u32 3, %s2747_s18 }
  0x61   : > { %v2975_v6 = vld [vmem:[#allocation2] sm:$0xff]  ;;  %2305 = vmatpush3.bf16.msra.mxu0 %v2977_v7  ;;  %v2990_v10 = vld [vmem:[#allocation2 + $0x8] sm:$0xff]  ;;  %2313 = vmatpush3.bf16.msra.mxu1 %v2977_v7  ;;  %v2131_v61 = vunpack.c.h.bf16 %v2156_v60  ;;  %v2130_v62 = vunpack.c.l.bf16 %v2156_v60  ;;  %s1911_s11 = scalar_lea.vmem %s2957_s24, %s2053_s8 [#allocation4]  ;;  %s878_s21 = sadd.s32 3, %s2747_s18 }
  0x62   : > { %2218 = vmatprep.mubr.msk.f32.mxu0 %vm3726_vm0, %v2975_v6  ;;  %v338_v8 = vld [vmem:[#allocation3] sm:$0xff]  ;;  %v339_v9 = vld [vmem:[#allocation3 + $0x8] sm:$0xff]  ;;  %2315 = vmatprep.subr.bf16.mxu0 %v2973_v4  ;;  %s703_s9 = sadd.s32 2, %s702_s7  ;;  %s3267_s6 = ssub.s32 4, %s2747_s18 }
  0x63   : > { %449 = vrot.lane.b32.xlu1 %v338_v8, %s2764_s27  ;;  %2323 = vmatprep.subr.bf16.mxu1 %v2973_v4  ;;  %s2121_s5 = sshll.u32 %s3267_s6, 3  ;;  %p3751_p3 = scmp.ne.s32.totalorder %s3729_s28, 0 }
  0x64   : > { %2219 = vmatmul.mubr.msk.f32.vlgmr.msra.gmra.mrb[0].mxu0 %vm3726_vm0, %v2990_v10  ;;  %s1057_s13 = scalar_lea.vmem %s2957_s24, %s2121_s5 [#allocation4]  ;;  %s2100_s5 = smul.u32 4294967240, %s2747_s18 }
  0x65   : > { %2317 = vmatpush3.bf16.msra.mxu0 %v2973_v4 }
  0x66   : > { %2319 = vmatprep.subr.bf16.mxu0 %v2977_v7 }
  0x67   : > { %451 = vrot.lane.b32.xlu1 %v339_v9, %s2764_s27 }
  0x69   : > { %2321 = vmatpush3.bf16.msra.mxu0 %v2977_v7 }
  0x6a   : > { %2331 = vmatprep.subr.bf16.mxu0 %v2973_v4 }
  0xd5   : > { %v3024_v38 = vpop.permute.xlu1 %449 }
  0xd9   : > { %v3027_v40 = vpop.permute.xlu1 %451 }
 0x137   : > { %v2220_v14 = vpop.f32.mrb[0].mxu0 }
 0x138   : > { %v422_v15 = vpop.f32.mrb[1].mxu0  ;;  %v432_v17 = vadd.f32 %v2220_v14, %v2127_v13  ;;  %v671_v13 = vstv %s527_s26  ;;  %s2080_s26 = smul.u32 4294967272, %s2747_s18 }
 0x139   : > { %v431_v16 = vadd.f32 %v2126_v12, %v422_v15  ;;  %vm673_vm5 = vcmp.gt.s32.totalorder %v3017_v32, %v671_v13  ;;  %vm672_vm6 = vcmp.gt.s32.totalorder %v3011_v27, %v671_v13 }
 0x13a   : > { %v2041_v22 = vmul.f32 -1.442695, %v432_v17  ;;  %s1929_s8 = scalar_lea.vmem %s2957_s24, %s2080_s26 [#allocation4] }
 0x13b   : > { %2447 = vtanh.f32 %v431_v16  ;;  %v2040_v21 = vmul.f32 -1.442695, %v431_v16 }
 0x13c   : > { %2449 = vtanh.f32 %v432_v17 }
 0x13d   : > { %2451 = vpow2.f32 %v2040_v21  ;;  %v675_v21 = vsel %vm673_vm5, 1, %v2765_v18 }
 0x13e   : > { %2453 = vpow2.f32 %v2041_v22  ;;  %v674_v22 = vsel %vm672_vm6, 1, %v2765_v18 }
 0x145   : > { %v2448_v19 = vpop.eup %2447 }
 0x146   : > { %459 = vrot.lane.b32.xlu0 %v2448_v19, %s2766_s10  ;;  %v2450_v20 = vpop.eup %2449 }
 0x147   : > { %v2452_v23 = vpop.eup %2451 }
 0x148   : > { %v439_v24 = vadd.f32 1.0, %v2452_v23  ;;  %v2454_v25 = vpop.eup %2453 }
 0x149   : > { %v440_v26 = vadd.f32 1.0, %v2454_v25 }
 0x14a   : > { %461 = vrot.lane.b32.xlu0 %v2450_v20, %s2766_s10  ;;  %2455 = vrcp.f32 %v439_v24 }
 0x14b   : > { %2457 = vrcp.f32 %v440_v26 }
 0x154   : > { %v2456_v29 = vpop.eup %2455 }
 0x155   : > { %v2458_v33 = vpop.eup %2457  ;;  %v455_v39 = vmul.f32 %v2456_v29, %v3024_v38 }
 0x156   : > { %v456_v43 = vmul.f32 %v2458_v33, %v3027_v40 }
 0x1b8   : > { %v460_v30 = vpop.permute.xlu0 %459 }
 0x1b9   : > { %v465_v31 = vmul.f32 %v2456_v29, %v460_v30 }
 0x1bb   : > { %469 = vrot.lane.b32.xlu0 %v465_v31, %s2764_s27 }
 0x1bc   : > { %v462_v34 = vpop.permute.xlu0 %461 }
 0x1bd   : > { %v466_v36 = vmul.f32 %v2458_v33, %v462_v34 }
 0x1bf   : > { %471 = vrot.lane.b32.xlu1 %v466_v36, %s2764_s27  ;;  %495 = vperm.xlu0 %2445, %v492_v35  }
 0x1c3   : > { %498 = vperm.xlu1 %2446, %v493_v37  }
 0x22d   : > { %v470_v41 = vpop.permute.xlu0 %469 }
 0x22e   : > { %v3029_v42 = vadd.f32 %v470_v41, %v455_v39 }
 0x230   : > { %2459 = vtanh.f32 %v3029_v42 }
 0x231   : > { %v472_v44 = vpop.permute.xlu1 %471 }
 0x232   : > { %v3033_v45 = vadd.f32 %v472_v44, %v456_v43 }
 0x234   : > { %2461 = vtanh.f32 %v3033_v45 }
 0x23a   : > { %v2460_v46 = vpop.eup %2459 }
 0x23b   : > { %481 = vrot.lane.b32.xlu1 %v2460_v46, %s2766_s10 }
 0x23e   : > { %v2462_v47 = vpop.eup %2461  ;;  %v3044_v49 = vpop.permute.xlu0 %495 }
 0x23f   : > { %483 = vrot.lane.b32.xlu0 %v2462_v47, %s2766_s10  ;;  %502 = vrot.lane.b32.xlu1 %v2975_v6, %s2767_s25  ;;  %vm500_vm3 = vcmp.eq.s32.totalorder %v3044_v49, 1 }
 0x240   : > { %v3093_v24 = vsel %vm500_vm3, %v3029_v42, %v3024_v38 }
 0x242   : > { %v3042_v48 = vpop.permute.xlu1 %498 }
 0x243   : > { %504 = vrot.lane.b32.xlu0 %v2990_v10, %s2767_s25  ;;  %vm501_vm4 = vcmp.eq.s32.totalorder %v3042_v48, 1 }
 0x244   : > { %v3087_v23 = vsel %vm501_vm4, %v3033_v45, %v3027_v40  ;;  %v2157_v45 = vld [vmem:[%s1911_s11 + $0x10] sm:$0xff]   ;;  %s1228_s11 = smul.u32 4294967293, %s2747_s18 }
 0x245   : > { %v2135_v46 = vunpack.c.h.bf16 %v2157_v45  ;;  %v2134_v47 = vunpack.c.l.bf16 %v2157_v45 }
 0x246   : > { %s1229_s7 = sadd.s32 5, %s1228_s11  ;;  %s2079_s11 = sshll.u32 %s3267_s6, 4 }
 0x2ad   : > { %v482_v50 = vpop.permute.xlu1 %481 }
 0x2ae   : > { %v3046_v51 = vmul.f32 %v2456_v29, %v482_v50 }
 0x2b1   : > { %v484_v52 = vpop.permute.xlu0 %483  ;;  %v503_v53 = vpop.permute.xlu1 %502 }
 0x2b2   : > { %v3052_v54 = vsel %vm500_vm3, %v3046_v51, %v503_v53  ;;  %v3056_v55 = vmul.f32 %v2458_v33, %v484_v52 }
 0x2b3   : > { %538 = vrot.lane.b32.xlu1 %v3052_v54, %s2764_s27 }
 0x2b5   : > { %v505_v56 = vpop.permute.xlu0 %504 }
 0x2b6   : > { %v3062_v57 = vsel %vm501_vm4, %v3056_v55, %v505_v56 }
 0x2b7   : > { %540 = vrot.lane.b32.xlu0 %v3062_v57, %s2764_s27 }
 0x325   : > { %v539_v58 = vpop.permute.xlu1 %538 }
 0x326   : > { %2229 = vmatprep.mubr.msk.f32.mxu1 %vm3726_vm0, %v539_v58 }
 0x329   : > { %v541_v59 = vpop.permute.xlu0 %540 }
 0x32a   : > { %2230 = vmatmul.mubr.msk.f32.vlgmr.msra.gmra.mrb[0].mxu1 %vm3726_vm0, %v541_v59 }
 0x32b   : > { %2325 = vmatpush3.bf16.msra.mxu1 %v2973_v4 }
 0x32c   : > { %2327 = vmatprep.subr.bf16.mxu1 %v2977_v7 }
 0x32f   : > { %2329 = vmatpush3.bf16.msra.mxu1 %v2977_v7 }
 0x330   : > { %2339 = vmatprep.subr.bf16.mxu1 %v2973_v4 }
 0x3fd   : > { %v2231_v63 = vpop.f32.mrb[0].mxu1 }
 0x3fe   : > { %v622_v0 = vadd.f32 %v2231_v63, %v2131_v61  ;;  %v612_v1 = vpop.f32.mrb[1].mxu1 }
 0x3ff   : > { %v621_v2 = vadd.f32 %v2130_v62, %v612_v1 }
 0x400   : > { %2463 = vtanh.f32 %v622_v0  ;;  %v2049_v6 = vmul.f32 -1.442695, %v622_v0  ;;  %v847_v0 = vstv %s703_s9  ;;  %s2090_s9 = smul.u32 4294967256, %s2747_s18 }
 0x401   : > { %2465 = vtanh.f32 %v621_v2  ;;  %v2048_v8 = vmul.f32 -1.442695, %v621_v2  ;;  %vm849_vm9 = vcmp.gt.s32.totalorder %v3017_v32, %v847_v0  ;;  %vm848_vm10 = vcmp.gt.s32.totalorder %v3011_v27, %v847_v0 }
 0x402   : > { %2467 = vpow2.f32 %v2049_v6  ;;  %s1937_s14 = scalar_lea.vmem %s2957_s24, %s2090_s9 [#allocation4]  ;;  %s2087_s9 = smul.u32 4294967248, %s2747_s18 }
 0x403   : > { %2469 = vpow2.f32 %v2048_v8 }
 0x40a   : > { %v2464_v3 = vpop.eup %2463 }
 0x40b   : > { %v2466_v5 = vpop.eup %2465  ;;  %643 = vrot.lane.b32.xlu0 %v2464_v3, %s2766_s10 }
 0x40c   : > { %641 = vrot.lane.b32.xlu1 %v2466_v5, %s2766_s10  ;;  %v2468_v9 = vpop.eup %2467 }
 0x40d   : > { %v2470_v10 = vpop.eup %2469  ;;  %v630_v11 = vadd.f32 1.0, %v2468_v9  ;;  %v851_v9 = vsel %vm849_vm9, 1, %v2765_v18 }
 0x40e   : > { %v629_v12 = vadd.f32 1.0, %v2470_v10  ;;  %v850_v10 = vsel %vm848_vm10, 1, %v2765_v18 }
 0x40f   : > { %2471 = vrcp.f32 %v630_v11 }
 0x410   : > { %2473 = vrcp.f32 %v629_v12 }
 0x419   : > { %v2472_v14 = vpop.eup %2471 }
 0x41a   : > { %v2474_v16 = vpop.eup %2473  ;;  %v638_v25 = vmul.f32 %v2472_v14, %v3087_v23 }
 0x41b   : > { %v637_v28 = vmul.f32 %v2474_v16, %v3093_v24 }
 0x47d   : > { %v644_v15 = vpop.permute.xlu0 %643 }
 0x47e   : > { %v648_v17 = vmul.f32 %v2472_v14, %v644_v15  ;;  %v642_v19 = vpop.permute.xlu1 %641 }
 0x47f   : > { %v647_v20 = vmul.f32 %v2474_v16, %v642_v19 }
 0x480   : > { %653 = vrot.lane.b32.xlu0 %v648_v17, %s2764_s27 }
 0x481   : > { %651 = vrot.lane.b32.xlu1 %v647_v20, %s2764_s27 }
 0x484   : > { %680 = vperm.xlu0 %2445, %v675_v21  }
 0x485   : > { %677 = vperm.xlu1 %2446, %v674_v22  }
 0x4f2   : > { %v654_v26 = vpop.permute.xlu0 %653 }
 0x4f3   : > { %v3097_v29 = vadd.f32 %v654_v26, %v638_v25  ;;  %v652_v30 = vpop.permute.xlu1 %651 }
 0x4f4   : > { %v3099_v31 = vadd.f32 %v652_v30, %v637_v28 }
 0x4f5   : > { %2475 = vtanh.f32 %v3097_v29 }
 0x4f6   : > { %2477 = vtanh.f32 %v3099_v31 }
 0x4ff   : > { %v2476_v33 = vpop.eup %2475 }
 0x500   : > { %v2478_v34 = vpop.eup %2477  ;;  %665 = vrot.lane.b32.xlu0 %v2476_v33, %s2766_s10 }
 0x501   : > { %663 = vrot.lane.b32.xlu1 %v2478_v34, %s2766_s10  ;;  %v2158_v34 = vld [vmem:[%s1918_s12 + $0x18] sm:$0xff]   ;;  %s1404_s12 = smul.u32 4294967291, %s2747_s18 }
 0x503   : > { %v3105_v35 = vpop.permute.xlu0 %680 }
 0x504   : > { %v3107_v36 = vpop.permute.xlu1 %677  ;;  %vm683_vm7 = vcmp.eq.s32.totalorder %v3105_v35, 1 }
 0x505   : > { %vm682_vm8 = vcmp.eq.s32.totalorder %v3107_v36, 1  ;;  %v3152_v11 = vsel %vm683_vm7, %v3097_v29, %v3087_v23 }
 0x506   : > { %v3158_v12 = vsel %vm682_vm8, %v3099_v31, %v3093_v24 }
 0x572   : > { %v666_v37 = vpop.permute.xlu0 %665 }
 0x573   : > { %v3109_v38 = vmul.f32 %v2472_v14, %v666_v37  ;;  %v664_v39 = vpop.permute.xlu1 %663  ;;  %v2139_v37 = vunpack.c.h.bf16 %v2158_v34 }
 0x574   : > { %v3112_v40 = vmul.f32 %v2474_v16, %v664_v39  ;;  %v2138_v39 = vunpack.c.l.bf16 %v2158_v34 }
 0x575   : > { %v3119_v41 = vsel %vm683_vm7, %v3109_v38, %v3062_v57 }
 0x576   : > { %716 = vrot.lane.b32.xlu0 %v3119_v41, %s2764_s27  ;;  %v3127_v42 = vsel %vm682_vm8, %v3112_v40, %v3052_v54 }
 0x577   : > { %714 = vrot.lane.b32.xlu1 %v3127_v42, %s2764_s27 }
 0x5e8   : > { %v717_v44 = vpop.permute.xlu0 %716 }
 0x5e9   : > { %v715_v43 = vpop.permute.xlu1 %714 }
 0x5ea   : > { %2240 = vmatprep.mubr.msk.f32.mxu0 %vm3726_vm0, %v715_v43 }
 0x5eb   : > { %2241 = vmatmul.mubr.msk.f32.vlgmr.msra.gmra.mrb[2].mxu0 %vm3726_vm0, %v717_v44 }
 0x5ec   : > { %2333 = vmatpush3.bf16.msra.mxu0 %v2973_v4 }
 0x5ed   : > { %2335 = vmatprep.subr.bf16.mxu0 %v2977_v7 }
 0x5f0   : > { %2337 = vmatpush3.bf16.msra.mxu0 %v2977_v7 }
 0x5f1   : > { %2347 = vmatprep.subr.bf16.mxu0 %v2973_v4 }
 0x6be   : > { %v2242_v50 = vpop.f32.mrb[2].mxu0 }
 0x6bf   : > { %v798_v52 = vadd.f32 %v2242_v50, %v2135_v46  ;;  %v788_v53 = vpop.f32.mrb[3].mxu0 }
 0x6c0   : > { %v797_v54 = vadd.f32 %v2134_v47, %v788_v53 }
 0x6c1   : > { %2479 = vtanh.f32 %v798_v52  ;;  %v2059_v58 = vmul.f32 -1.442695, %v798_v52 }
 0x6c2   : > { %2481 = vtanh.f32 %v797_v54  ;;  %v2058_v59 = vmul.f32 -1.442695, %v797_v54 }
 0x6c3   : > { %2483 = vpow2.f32 %v2059_v58 }
 0x6c4   : > { %2485 = vpow2.f32 %v2058_v59 }
 0x6cb   : > { %v2480_v56 = vpop.eup %2479 }
 0x6cc   : > { %v2482_v57 = vpop.eup %2481  ;;  %819 = vrot.lane.b32.xlu0 %v2480_v56, %s2766_s10 }
 0x6cd   : > { %817 = vrot.lane.b32.xlu1 %v2482_v57, %s2766_s10  ;;  %v2484_v60 = vpop.eup %2483  ;;  %v1022_v57 = vstv %s878_s21  ;;  %s1405_s21 = sadd.s32 6, %s1404_s12 }
 0x6ce   : > { %v2486_v61 = vpop.eup %2485  ;;  %v806_v62 = vadd.f32 1.0, %v2484_v60  ;;  %vm1024_vm13 = vcmp.gt.s32.totalorder %v3017_v32, %v1022_v57  ;;  %vm1023_vm14 = vcmp.gt.s32.totalorder %v3011_v27, %v1022_v57 }
 0x6cf   : > { %v805_v63 = vadd.f32 1.0, %v2486_v61  ;;  %v1026_v0 = vsel %vm1024_vm13, 1, %v2765_v18 }
 0x6d0   : > { %2487 = vrcp.f32 %v806_v62 }
 0x6d1   : > { %2489 = vrcp.f32 %v805_v63 }
 0x6da   : > { %v2488_v1 = vpop.eup %2487 }
 0x6db   : > { %v2490_v3 = vpop.eup %2489  ;;  %v814_v13 = vmul.f32 %v2488_v1, %v3152_v11 }
 0x6dc   : > { %v813_v15 = vmul.f32 %v2490_v3, %v3158_v12 }
 0x73e   : > { %v820_v2 = vpop.permute.xlu0 %819 }
 0x73f   : > { %v824_v5 = vmul.f32 %v2488_v1, %v820_v2  ;;  %v818_v6 = vpop.permute.xlu1 %817 }
 0x740   : > { %v823_v8 = vmul.f32 %v2490_v3, %v818_v6 }
 0x741   : > { %829 = vrot.lane.b32.xlu0 %v824_v5, %s2764_s27 }
 0x742   : > { %827 = vrot.lane.b32.xlu1 %v823_v8, %s2764_s27 }
 0x745   : > { %856 = vperm.xlu0 %2445, %v851_v9  }
 0x746   : > { %853 = vperm.xlu1 %2446, %v850_v10  }
 0x7b3   : > { %v830_v14 = vpop.permute.xlu0 %829 }
 0x7b4   : > { %v3162_v16 = vadd.f32 %v830_v14, %v814_v13  ;;  %v828_v17 = vpop.permute.xlu1 %827 }
 0x7b5   : > { %v3164_v19 = vadd.f32 %v828_v17, %v813_v15 }
 0x7b6   : > { %2491 = vtanh.f32 %v3162_v16 }
 0x7b7   : > { %2493 = vtanh.f32 %v3164_v19 }
 0x7c0   : > { %v2492_v20 = vpop.eup %2491 }
 0x7c1   : > { %v2494_v21 = vpop.eup %2493  ;;  %841 = vrot.lane.b32.xlu0 %v2492_v20, %s2766_s10 }
 0x7c2   : > { %839 = vrot.lane.b32.xlu1 %v2494_v21, %s2766_s10 }
 0x7c4   : > { %v3170_v22 = vpop.permute.xlu0 %856 }
 0x7c5   : > { %v3172_v23 = vpop.permute.xlu1 %853  ;;  %vm859_vm11 = vcmp.eq.s32.totalorder %v3170_v22, 1 }
 0x7c6   : > { %vm858_vm12 = vcmp.eq.s32.totalorder %v3172_v23, 1  ;;  %v3217_v2 = vsel %vm859_vm11, %v3162_v16, %v3152_v11 }
 0x833   : > { %v842_v24 = vpop.permute.xlu0 %841 }
 0x834   : > { %v3174_v25 = vmul.f32 %v2488_v1, %v842_v24  ;;  %v840_v26 = vpop.permute.xlu1 %839  ;;  %v1025_v1 = vsel %vm1023_vm14, 1, %v2765_v18 }
 0x835   : > { %v3177_v28 = vmul.f32 %v2490_v3, %v840_v26  ;;  %v3223_v3 = vsel %vm858_vm12, %v3164_v19, %v3158_v12 }
 0x836   : > { %v3184_v29 = vsel %vm859_vm11, %v3174_v25, %v3119_v41  ;;  %v865_v48 = vsel %vm859_vm11, %v3174_v25, 0.0 }
 0x837   : > { %891 = vrot.lane.b32.xlu0 %v3184_v29, %s2764_s27  ;;  %v3192_v30 = vsel %vm858_vm12, %v3177_v28, %v3127_v42  ;;  %v864_v49 = vsel %vm858_vm12, %v3177_v28, 0.0 }
 0x838   : > { %889 = vrot.lane.b32.xlu1 %v3192_v30, %s2764_s27 }
 0x8a9   : > { %v892_v33 = vpop.permute.xlu0 %891 }
 0x8aa   : > { %v890_v31 = vpop.permute.xlu1 %889 }
 0x8ab   : > { %2251 = vmatprep.mubr.msk.f32.mxu1 %vm3726_vm0, %v890_v31 }
 0x8ac   : > { %2252 = vmatmul.mubr.msk.f32.vlgmr.msra.gmra.mrb[2].mxu1 %vm3726_vm0, %v892_v33 }
 0x8ad   : > { %2341 = vmatpush3.bf16.msra.mxu1 %v2973_v4 }
 0x8ae   : > { %2343 = vmatprep.subr.bf16.mxu1 %v2977_v7 }
 0x8b1   : > { %2345 = vmatpush3.bf16.msra.mxu1 %v2977_v7 }
 0x8b2   : > { %2355 = vmatprep.subr.bf16.mxu1 %v2973_v4 }
 0x97f   : > { %v2253_v41 = vpop.f32.mrb[2].mxu1 }
 0x980   : > { %v973_v42 = vadd.f32 %v2253_v41, %v2139_v37  ;;  %v963_v43 = vpop.f32.mrb[3].mxu1 }
 0x981   : > { %v972_v44 = vadd.f32 %v2138_v39, %v963_v43 }
 0x982   : > { %2495 = vtanh.f32 %v973_v42  ;;  %v2069_v47 = vmul.f32 -1.442695, %v973_v42 }
 0x983   : > { %2497 = vtanh.f32 %v972_v44  ;;  %v2068_v50 = vmul.f32 -1.442695, %v972_v44 }
 0x984   : > { %2499 = vpow2.f32 %v2069_v47 }
 0x985   : > { %2501 = vpow2.f32 %v2068_v50 }
 0x98c   : > { %v2496_v45 = vpop.eup %2495 }
 0x98d   : > { %v2498_v46 = vpop.eup %2497  ;;  %994 = vrot.lane.b32.xlu0 %v2496_v45, %s2766_s10 }
 0x98e   : > { %992 = vrot.lane.b32.xlu1 %v2498_v46, %s2766_s10  ;;  %v2500_v52 = vpop.eup %2499 }
 0x98f   : > { %v2502_v53 = vpop.eup %2501  ;;  %v981_v54 = vadd.f32 1.0, %v2500_v52 }
 0x990   : > { %v980_v56 = vadd.f32 1.0, %v2502_v53  ;;  %v1197_v53 = vstv %s3267_s6  ;;  %s2097_s6 = smul.u32 4294967216, %s2747_s18 }
 0x991   : > { %2503 = vrcp.f32 %v981_v54  ;;  %vm1199_vm2 = vcmp.gt.s32.totalorder %v3017_v32, %v1197_v53  ;;  %vm1198_vm5 = vcmp.gt.s32.totalorder %v3011_v27, %v1197_v53 }
 0x992   : > { %2505 = vrcp.f32 %v980_v56 }
 0x99b   : > { %v2504_v58 = vpop.eup %2503 }
 0x99c   : > { %v2506_v60 = vpop.eup %2505  ;;  %v989_v5 = vmul.f32 %v2504_v58, %v3217_v2 }
 0x99d   : > { %v988_v8 = vmul.f32 %v2506_v60, %v3223_v3 }
 0x9ff   : > { %v995_v59 = vpop.permute.xlu0 %994 }
 0xa00   : > { %v999_v61 = vmul.f32 %v2504_v58, %v995_v59  ;;  %v993_v62 = vpop.permute.xlu1 %992 }
 0xa01   : > { %v998_v63 = vmul.f32 %v2506_v60, %v993_v62  ;;  %v1200_v62 = vsel %vm1198_vm5, 1, %v2765_v18 }
 0xa02   : > { %1004 = vrot.lane.b32.xlu0 %v999_v61, %s2764_s27  ;;  %v1201_v61 = vsel %vm1199_vm2, 1, %v2765_v18 }
 0xa03   : > { %1002 = vrot.lane.b32.xlu1 %v998_v63, %s2764_s27 }
 0xa06   : > { %1031 = vperm.xlu0 %2445, %v1026_v0  }
 0xa07   : > { %1028 = vperm.xlu1 %2446, %v1025_v1  }
 0xa74   : > { %v1005_v6 = vpop.permute.xlu0 %1004 }
 0xa75   : > { %v3227_v9 = vadd.f32 %v1005_v6, %v989_v5  ;;  %v1003_v10 = vpop.permute.xlu1 %1002 }
 0xa76   : > { %v3229_v13 = vadd.f32 %v1003_v10, %v988_v8 }
 0xa77   : > { %2507 = vtanh.f32 %v3227_v9 }
 0xa78   : > { %2509 = vtanh.f32 %v3229_v13 }
 0xa81   : > { %v2508_v11 = vpop.eup %2507 }
 0xa82   : > { %v2510_v14 = vpop.eup %2509  ;;  %1016 = vrot.lane.b32.xlu0 %v2508_v11, %s2766_s10 }
 0xa83   : > { %1014 = vrot.lane.b32.xlu1 %v2510_v14, %s2766_s10 }
 0xa85   : > { %v3235_v12 = vpop.permute.xlu0 %1031 }
 0xa86   : > { %v3237_v15 = vpop.permute.xlu1 %1028  ;;  %vm1034_vm15 = vcmp.eq.s32.totalorder %v3235_v12, 1 }
 0xa87   : > { %vm1033_vm1 = vcmp.eq.s32.totalorder %v3237_v15, 1  ;;  %v3284_v63 = vsel %vm1034_vm15, %v3227_v9, %v3217_v2 }
 0xa88   : > { %v3290_v0 = vsel %vm1033_vm1, %v3229_v13, %v3223_v3 }
 0xaf4   : > { %v1017_v16 = vpop.permute.xlu0 %1016 }
 0xaf5   : > { %v3239_v17 = vmul.f32 %v2504_v58, %v1017_v16  ;;  %v1015_v19 = vpop.permute.xlu1 %1014 }
 0xaf6   : > { %v3242_v20 = vmul.f32 %v2506_v60, %v1015_v19 }
 0xaf7   : > { %v3249_v21 = vsel %vm1034_vm15, %v3239_v17, %v3184_v29  ;;  %v2141_v29 = vld [vmem:[%s1057_s13] sm:$0xff]   ;;  %s1945_s13 = scalar_lea.vmem %s2957_s24, %s2100_s5 [#allocation4]  ;;  %s1580_s24 = smul.u32 4294967289, %s2747_s18 }
 0xaf8   : > { %1066 = vrot.lane.b32.xlu0 %v3249_v21, %s2764_s27  ;;  %v3257_v24 = vsel %vm1033_vm1, %v3242_v20, %v3192_v30  ;;  %v2143_v30 = vunpack.c.h.bf16 %v2141_v29  ;;  %v2142_v33 = vunpack.c.l.bf16 %v2141_v29  ;;  %s2050_s5 = smul.u32 80, %s2747_s18 }
 0xaf9   : > { %1064 = vrot.lane.b32.xlu1 %v3257_v24, %s2764_s27  ;;  %s1581_s26 = sadd.s32 7, %s1580_s24  ;;  %s2060_s24 = smul.u32 48, %s2747_s18 }
 0xb6a   : > { %v1067_v31 = vpop.permute.xlu0 %1066 }
 0xb6b   : > { %v1065_v26 = vpop.permute.xlu1 %1064 }
 0xb6c   : > { %2262 = vmatprep.mubr.msk.f32.mxu0 %vm3726_vm0, %v1065_v26 }
 0xb6d   : > { %2263 = vmatmul.mubr.msk.f32.vlgmr.msra.gmra.mrb[4].mxu0 %vm3726_vm0, %v1067_v31 }
 0xb6e   : > { %2349 = vmatpush3.bf16.msra.mxu0 %v2973_v4 }
 0xb6f   : > { %2351 = vmatprep.subr.bf16.mxu0 %v2977_v7 }
 0xb72   : > { %2353 = vmatpush3.bf16.msra.mxu0 %v2977_v7 }
 0xc40   : > { %v2264_v34 = vpop.f32.mrb[4].mxu0 }
 0xc41   : > { %v1148_v37 = vadd.f32 %v2264_v34, %v2143_v30  ;;  %v1138_v39 = vpop.f32.mrb[5].mxu0 }
 0xc42   : > { %v1147_v41 = vadd.f32 %v2142_v33, %v1138_v39 }
 0xc43   : > { %2511 = vtanh.f32 %v1148_v37  ;;  %v2078_v44 = vmul.f32 -1.442695, %v1148_v37 }
 0xc44   : > { %2513 = vtanh.f32 %v1147_v41  ;;  %v2077_v45 = vmul.f32 -1.442695, %v1147_v41 }
 0xc45   : > { %2515 = vpow2.f32 %v2078_v44 }
 0xc46   : > { %2517 = vpow2.f32 %v2077_v45 }
 0xc4d   : > { %v2512_v42 = vpop.eup %2511 }
 0xc4e   : > { %v2514_v43 = vpop.eup %2513  ;;  %1169 = vrot.lane.b32.xlu0 %v2512_v42, %s2766_s10 }
 0xc4f   : > { %1167 = vrot.lane.b32.xlu1 %v2514_v43, %s2766_s10  ;;  %v2516_v46 = vpop.eup %2515 }
 0xc50   : > { %v2518_v47 = vpop.eup %2517  ;;  %v1156_v50 = vadd.f32 1.0, %v2516_v46 }
 0xc51   : > { %v1155_v52 = vadd.f32 1.0, %v2518_v47 }
 0xc52   : > { %2519 = vrcp.f32 %v1156_v50 }
 0xc53   : > { %2521 = vrcp.f32 %v1155_v52  ;;  %v1373_v52 = vstv %s1229_s7 }
 0xc54   : > { %vm1375_vm10 = vcmp.gt.s32.totalorder %v3017_v32, %v1373_v52  ;;  %vm1374_vm13 = vcmp.gt.s32.totalorder %v3011_v27, %v1373_v52 }
 0xc5c   : > { %v2520_v54 = vpop.eup %2519 }
 0xc5d   : > { %v2522_v57 = vpop.eup %2521  ;;  %v1164_v1 = vmul.f32 %v2520_v54, %v3284_v63 }
 0xc5e   : > { %v1163_v6 = vmul.f32 %v2522_v57, %v3290_v0 }
 0xcc0   : > { %v1170_v56 = vpop.permute.xlu0 %1169 }
 0xcc1   : > { %v1174_v58 = vmul.f32 %v2520_v54, %v1170_v56  ;;  %v1168_v59 = vpop.permute.xlu1 %1167 }
 0xcc2   : > { %v1173_v60 = vmul.f32 %v2522_v57, %v1168_v59 }
 0xcc3   : > { %1179 = vrot.lane.b32.xlu0 %v1174_v58, %s2764_s27 }
 0xcc4   : > { %1177 = vrot.lane.b32.xlu1 %v1173_v60, %s2764_s27  ;;  %v1377_v60 = vsel %vm1375_vm10, 1, %v2765_v18 }
 0xcc7   : > { %1206 = vperm.xlu0 %2445, %v1201_v61   ;;  %v1376_v61 = vsel %vm1374_vm13, 1, %v2765_v18 }
 0xcc8   : > { %1203 = vperm.xlu1 %2446, %v1200_v62  }
 0xd35   : > { %v1180_v5 = vpop.permute.xlu0 %1179 }
 0xd36   : > { %v3294_v8 = vadd.f32 %v1180_v5, %v1164_v1  ;;  %v1178_v10 = vpop.permute.xlu1 %1177 }
 0xd37   : > { %v3296_v11 = vadd.f32 %v1178_v10, %v1163_v6 }
 0xd38   : > { %2523 = vtanh.f32 %v3294_v8 }
 0xd39   : > { %2525 = vtanh.f32 %v3296_v11 }
 0xd42   : > { %v2524_v2 = vpop.eup %2523 }
 0xd43   : > { %v2526_v9 = vpop.eup %2525  ;;  %1191 = vrot.lane.b32.xlu0 %v2524_v2, %s2766_s10 }
 0xd44   : > { %1189 = vrot.lane.b32.xlu1 %v2526_v9, %s2766_s10 }
 0xd46   : > { %v3302_v3 = vpop.permute.xlu0 %1206 }
 0xd47   : > { %v3304_v13 = vpop.permute.xlu1 %1203  ;;  %vm1209_vm6 = vcmp.eq.s32.totalorder %v3302_v3, 1 }
 0xd48   : > { %vm1208_vm9 = vcmp.eq.s32.totalorder %v3304_v13, 1  ;;  %v3348_v62 = vsel %vm1209_vm6, %v3294_v8, %v3284_v63 }
 0xd49   : > { %v3354_v1 = vsel %vm1208_vm9, %v3296_v11, %v3290_v0 }
 0xdb5   : > { %v1192_v14 = vpop.permute.xlu0 %1191 }
 0xdb6   : > { %v3306_v16 = vmul.f32 %v2520_v54, %v1192_v14  ;;  %v1190_v19 = vpop.permute.xlu1 %1189 }
 0xdb7   : > { %v3309_v26 = vmul.f32 %v2522_v57, %v1190_v19 }
 0xdb8   : > { %v3316_v31 = vsel %vm1209_vm6, %v3306_v16, %v3249_v21  ;;  %v2159_v21 = vld [vmem:[%s1929_s8 + $0x28] sm:$0xff]   ;;  %v1215_v35 = vsel %vm1209_vm6, %v3306_v16, 0.0  ;;  %s2070_s8 = sshll.u32 %s2747_s18, 4 }
 0xdb9   : > { %1242 = vrot.lane.b32.xlu0 %v3316_v31, %s2764_s27  ;;  %v3324_v29 = vsel %vm1208_vm9, %v3309_v26, %v3257_v24  ;;  %v2147_v24 = vunpack.c.h.bf16 %v2159_v21  ;;  %v2146_v34 = vunpack.c.l.bf16 %v2159_v21  ;;  %v1214_v36 = vsel %vm1208_vm9, %v3309_v26, 0.0 }
 0xdba   : > { %1240 = vrot.lane.b32.xlu1 %v3324_v29, %s2764_s27 }
 0xe2b   : > { %v1243_v33 = vpop.permute.xlu0 %1242 }
 0xe2c   : > { %v1241_v30 = vpop.permute.xlu1 %1240 }
 0xe2d   : > { %2273 = vmatprep.mubr.msk.f32.mxu1 %vm3726_vm0, %v1241_v30 }
 0xe2e   : > { %2274 = vmatmul.mubr.msk.f32.vlgmr.msra.gmra.mrb[4].mxu1 %vm3726_vm0, %v1243_v33 }
 0xe2f   : > { %2357 = vmatpush3.bf16.msra.mxu1 %v2973_v4 }
 0xe30   : > { %2359 = vmatprep.subr.bf16.mxu1 %v2977_v7 }
 0xe33   : > { %2361 = vmatpush3.bf16.msra.mxu1 %v2977_v7 }
 0xf01   : > { %v2275_v37 = vpop.f32.mrb[4].mxu1 }
 0xf02   : > { %v1324_v39 = vadd.f32 %v2275_v37, %v2147_v24  ;;  %v1314_v41 = vpop.f32.mrb[5].mxu1 }
 0xf03   : > { %v1323_v42 = vadd.f32 %v2146_v34, %v1314_v41 }
 0xf04   : > { %2527 = vtanh.f32 %v1324_v39  ;;  %v2086_v4 = vmul.f32 -1.442695, %v1324_v39 }
 0xf05   : > { %2529 = vtanh.f32 %v1323_v42  ;;  %v2085_v7 = vmul.f32 -1.442695, %v1323_v42 }
 0xf06   : > { %2531 = vpow2.f32 %v2086_v4 }
 0xf07   : > { %2533 = vpow2.f32 %v2085_v7 }
 0xf0e   : > { %v2528_v43 = vpop.eup %2527 }
 0xf0f   : > { %v2530_v44 = vpop.eup %2529  ;;  %1345 = vrot.lane.b32.xlu0 %v2528_v43, %s2766_s10 }
 0xf10   : > { %1343 = vrot.lane.b32.xlu1 %v2530_v44, %s2766_s10  ;;  %v2532_v45 = vpop.eup %2531 }
 0xf11   : > { %v2534_v46 = vpop.eup %2533  ;;  %v1332_v47 = vadd.f32 1.0, %v2532_v45 }
 0xf12   : > { %v1331_v50 = vadd.f32 1.0, %v2534_v46 }
 0xf13   : > { %2535 = vrcp.f32 %v1332_v47 }
 0xf14   : > { %2537 = vrcp.f32 %v1331_v50 }
 0xf1d   : > { %v2536_v53 = vpop.eup %2535 }
 0xf1e   : > { %v2538_v56 = vpop.eup %2537  ;;  %v1340_v5 = vmul.f32 %v2536_v53, %v3348_v62 }
 0xf1f   : > { %v1339_v10 = vmul.f32 %v2538_v56, %v3354_v1 }
 0xf81   : > { %v1346_v54 = vpop.permute.xlu0 %1345 }
 0xf82   : > { %v1350_v57 = vmul.f32 %v2536_v53, %v1346_v54  ;;  %v1344_v58 = vpop.permute.xlu1 %1343 }
 0xf83   : > { %v1349_v59 = vmul.f32 %v2538_v56, %v1344_v58 }
 0xf84   : > { %1355 = vrot.lane.b32.xlu0 %v1350_v57, %s2764_s27 }
 0xf85   : > { %1353 = vrot.lane.b32.xlu1 %v1349_v59, %s2764_s27 }
 0xf88   : > { %1382 = vperm.xlu0 %2445, %v1377_v60  }
 0xf89   : > { %1379 = vperm.xlu1 %2446, %v1376_v61  }
 0xff6   : > { %v1356_v6 = vpop.permute.xlu0 %1355 }
 0xff7   : > { %v3358_v2 = vadd.f32 %v1356_v6, %v1340_v5  ;;  %v1354_v9 = vpop.permute.xlu1 %1353 }
 0xff8   : > { %v3360_v14 = vadd.f32 %v1354_v9, %v1339_v10 }
 0xff9   : > { %2539 = vtanh.f32 %v3358_v2 }
 0xffa   : > { %2541 = vtanh.f32 %v3360_v14 }
0x1003   : > { %v2540_v63 = vpop.eup %2539 }
0x1004   : > { %v2542_v8 = vpop.eup %2541  ;;  %1367 = vrot.lane.b32.xlu0 %v2540_v63, %s2766_s10 }
0x1005   : > { %1365 = vrot.lane.b32.xlu1 %v2542_v8, %s2766_s10 }
0x1007   : > { %v3366_v0 = vpop.permute.xlu0 %1382 }
0x1008   : > { %v3368_v11 = vpop.permute.xlu1 %1379  ;;  %vm1385_vm14 = vcmp.eq.s32.totalorder %v3366_v0, 1 }
0x1009   : > { %vm1384_vm2 = vcmp.eq.s32.totalorder %v3368_v11, 1  ;;  %v3409_v9 = vsel %vm1385_vm14, %v3358_v2, %v3348_v62 }
0x1076   : > { %v1368_v19 = vpop.permute.xlu0 %1367 }
0x1077   : > { %v3370_v30 = vmul.f32 %v2536_v53, %v1368_v19  ;;  %v1366_v33 = vpop.permute.xlu1 %1365 }
0x1078   : > { %v3373_v21 = vmul.f32 %v2538_v56, %v1366_v33  ;;  %v1549_v56 = vstv %s1405_s21 }
0x1079   : > { %v3380_v24 = vsel %vm1385_vm14, %v3370_v30, %v3316_v31  ;;  %v2160_v31 = vld [vmem:[%s1937_s14 + $0x30] sm:$0xff]   ;;  %vm1551_vm5 = vcmp.gt.s32.totalorder %v3017_v32, %v1549_v56  ;;  %vm1550_vm10 = vcmp.gt.s32.totalorder %v3011_v27, %v1549_v56  ;;  %v3415_v27 = vsel %vm1384_vm2, %v3360_v14, %v3354_v1  ;;  %s2042_s14 = smul.u32 112, %s2747_s18 }
0x107a   : > { %1418 = vrot.lane.b32.xlu0 %v3380_v24, %s2764_s27  ;;  %v3388_v34 = vsel %vm1384_vm2, %v3373_v21, %v3324_v29  ;;  %v2151_v41 = vunpack.c.h.bf16 %v2160_v31  ;;  %v2150_v42 = vunpack.c.l.bf16 %v2160_v31  ;;  %v1553_v6 = vsel %vm1551_vm5, 1, %v2765_v18 }
0x107b   : > { %1416 = vrot.lane.b32.xlu1 %v3388_v34, %s2764_s27  ;;  %v1552_v10 = vsel %vm1550_vm10, 1, %v2765_v18 }
0x10ec   : > { %v1419_v39 = vpop.permute.xlu0 %1418 }
0x10ed   : > { %v1417_v37 = vpop.permute.xlu1 %1416 }
0x10ee   : > { %2284 = vmatprep.mubr.msk.f32.mxu0 %vm3726_vm0, %v1417_v37 }
0x10ef   : > { %2285 = vmatmul.mubr.msk.f32.vlgmr.msra.gmra.mrb[6].mxu0 %vm3726_vm0, %v1419_v39 }
0x11c2   : > { %v2286_v43 = vpop.f32.mrb[6].mxu0 }
0x11c3   : > { %v1500_v44 = vadd.f32 %v2286_v43, %v2151_v41  ;;  %v1490_v4 = vpop.f32.mrb[7].mxu0 }
0x11c4   : > { %v1499_v7 = vadd.f32 %v2150_v42, %v1490_v4 }
0x11c5   : > { %2543 = vtanh.f32 %v1500_v44  ;;  %v2096_v46 = vmul.f32 -1.442695, %v1500_v44 }
0x11c6   : > { %2545 = vtanh.f32 %v1499_v7  ;;  %v2095_v47 = vmul.f32 -1.442695, %v1499_v7 }
0x11c7   : > { %2547 = vpow2.f32 %v2096_v46 }
0x11c8   : > { %2549 = vpow2.f32 %v2095_v47 }
0x11cf   : > { %v2544_v29 = vpop.eup %2543 }
0x11d0   : > { %v2546_v45 = vpop.eup %2545  ;;  %1521 = vrot.lane.b32.xlu0 %v2544_v29, %s2766_s10 }
0x11d1   : > { %1519 = vrot.lane.b32.xlu1 %v2546_v45, %s2766_s10  ;;  %v2548_v50 = vpop.eup %2547 }
0x11d2   : > { %v2550_v52 = vpop.eup %2549  ;;  %v1508_v53 = vadd.f32 1.0, %v2548_v50 }
0x11d3   : > { %v1507_v54 = vadd.f32 1.0, %v2550_v52 }
0x11d4   : > { %2551 = vrcp.f32 %v1508_v53 }
0x11d5   : > { %2553 = vrcp.f32 %v1507_v54 }
0x11de   : > { %v2552_v57 = vpop.eup %2551 }
0x11df   : > { %v2554_v59 = vpop.eup %2553  ;;  %v1516_v32 = vmul.f32 %v2552_v57, %v3409_v9 }
0x11e0   : > { %v1515_v8 = vmul.f32 %v2554_v59, %v3415_v27 }
0x1242   : > { %v1522_v58 = vpop.permute.xlu0 %1521 }
0x1243   : > { %v1526_v60 = vmul.f32 %v2552_v57, %v1522_v58  ;;  %v1520_v61 = vpop.permute.xlu1 %1519 }
0x1244   : > { %v1525_v5 = vmul.f32 %v2554_v59, %v1520_v61  ;;  %v1725_v61 = vstv %s1581_s26 }
0x1245   : > { %1531 = vrot.lane.b32.xlu0 %v1526_v60, %s2764_s27 }
0x1246   : > { %1529 = vrot.lane.b32.xlu1 %v1525_v5, %s2764_s27 }
0x1249   : > { %1558 = vperm.xlu0 %2445, %v1553_v6  }
0x124a   : > { %1555 = vperm.xlu1 %2446, %v1552_v10  }
0x12b7   : > { %v1532_v63 = vpop.permute.xlu0 %1531 }
0x12b8   : > { %v3419_v19 = vadd.f32 %v1532_v63, %v1516_v32  ;;  %v1530_v33 = vpop.permute.xlu1 %1529 }
0x12b9   : > { %v3421_v37 = vadd.f32 %v1530_v33, %v1515_v8  ;;  %v2575_v8 = vld [vmem:[%s3719_s0 + $0x8] sm:$0xff] }
0x12ba   : > { %2555 = vtanh.f32 %v3419_v19  ;;  %vm1727_vm10 = vcmp.gt.s32.totalorder %v2575_v8, %v1725_v61 }
0x12bb   : > { %2557 = vtanh.f32 %v3421_v37 }
0x12c4   : > { %v2556_v62 = vpop.eup %2555 }
0x12c5   : > { %v2558_v2 = vpop.eup %2557  ;;  %1543 = vrot.lane.b32.xlu0 %v2556_v62, %s2766_s10  ;;  %v2576_v62 = vld [vmem:[%s3719_s0] sm:$0xff] }
0x12c6   : > { %1541 = vrot.lane.b32.xlu1 %v2558_v2, %s2766_s10  ;;  %v1729_v2 = vsel %vm1727_vm10, 1, %v2765_v18 }
0x12c8   : > { %v3427_v1 = vpop.permute.xlu0 %1558 }
0x12c9   : > { %v3429_v14 = vpop.permute.xlu1 %1555  ;;  %vm1561_vm13 = vcmp.eq.s32.totalorder %v3427_v1, 1 }
0x12ca   : > { %vm1560_vm5 = vcmp.eq.s32.totalorder %v3429_v14, 1 }
0x1337   : > { %v1544_v39 = vpop.permute.xlu0 %1543 }
0x1338   : > { %v3431_v31 = vmul.f32 %v2552_v57, %v1544_v39  ;;  %v1542_v41 = vpop.permute.xlu1 %1541 }
0x1339   : > { %v3434_v42 = vmul.f32 %v2554_v59, %v1542_v41  ;;  %v3480_v41 = vsel %vm1561_vm13, %v3419_v19, %v3409_v9 }
0x133a   : > { %v3441_v43 = vsel %vm1561_vm13, %v3431_v31, %v3380_v24  ;;  %v2161_v24 = vld [vmem:[%s1945_s13 + $0x38] sm:$0xff]   ;;  %v1567_v22 = vsel %vm1561_vm13, %v3431_v31, 0.0 }
0x133b   : > { %1594 = vrot.lane.b32.xlu0 %v3441_v43, %s2764_s27  ;;  %v3449_v44 = vsel %vm1560_vm5, %v3434_v42, %v3388_v34  ;;  %v2155_v29 = vunpack.c.h.bf16 %v2161_v24  ;;  %v2154_v45 = vunpack.c.l.bf16 %v2161_v24  ;;  %v1566_v23 = vsel %vm1560_vm5, %v3434_v42, 0.0 }
0x133c   : > { %1592 = vrot.lane.b32.xlu1 %v3449_v44, %s2764_s27 }
0x13ad   : > { %v1595_v7 = vpop.permute.xlu0 %1594 }
0x13ae   : > { %v1593_v4 = vpop.permute.xlu1 %1592 }
0x13af   : > { %2295 = vmatprep.mubr.msk.f32.mxu1 %vm3726_vm0, %v1593_v4  ;;  %v3486_v4 = vsel %vm1560_vm5, %v3421_v37, %v3415_v27  ;;  %v513_v27 = vsel %vm501_vm4, %v3056_v55, 0.0  ;;  %v512_v37 = vsel %vm500_vm3, %v3046_v51, 0.0  ;;  %v1040_v51 = vsel %vm1034_vm15, %v3239_v17, 0.0 }
0x13b0   : > { %2296 = vmatmul.mubr.msk.f32.vlgmr.msra.gmra.mrb[6].mxu1 %vm3726_vm0, %v1595_v7  ;;  %vm1726_vm0 = vcmp.gt.s32.totalorder %v2576_v62, %v1725_v61  ;;  %v1039_v55 = vsel %vm1033_vm1, %v3242_v20, 0.0  ;;  %vm3735_vm4 = vcmask 261120  }
0x13b1   : > { %v1728_v39 = vsel %vm1726_vm0, 1, %v2765_v18  ;;  %vm3738_vm11 = vmmov %vm3735_vm4 }
0x13b2   : > { %vm3739_vm12 = vmmov %vm3735_vm4 }
0x13b3   : > { %vm3740_vm15 = vmmov %vm3735_vm4 }
0x13b4   : > { %vm3741_vm1 = vmmov %vm3735_vm4 }
0x13b5   : > { %vm3742_vm6 = vmmov %vm3741_vm1 }
0x13b6   : > { %vm3743_vm9 = vmmov %vm3741_vm1 }
0x13b7   : > { %vm3746_vm13 = vmmov %vm3741_vm1 }
0x13b8   : > { %vm3747_vm5 = vmmov %vm3741_vm1 }
0x13b9   : > { %vm3748_vm10 = vmmov %vm3741_vm1 }
0x1483   : > { %v2297_v46 = vpop.f32.mrb[6].mxu1 }
0x1484   : > { %v1676_v47 = vadd.f32 %v2297_v46, %v2155_v29  ;;  %v1666_v50 = vpop.f32.mrb[7].mxu1 }
0x1485   : > { %v1675_v52 = vadd.f32 %v2154_v45, %v1666_v50  ;;  %v688_v50 = vsel %vm682_vm8, %v3112_v40, 0.0  ;;  %v1390_v40 = vsel %vm1384_vm2, %v3373_v21, 0.0  ;;  %vm3737_vm8 = vmmov %vm3735_vm4 }
0x1486   : > { %2559 = vtanh.f32 %v1676_v47  ;;  %v2106_v54 = vmul.f32 -1.442695, %v1676_v47  ;;  %v689_v47 = vsel %vm683_vm7, %v3109_v38, 0.0  ;;  %v1391_v38 = vsel %vm1385_vm14, %v3370_v30, 0.0  ;;  %vm3736_vm7 = vmmov %vm3735_vm4 }
0x1487   : > { %2561 = vtanh.f32 %v1675_v52  ;;  %v2105_v56 = vmul.f32 -1.442695, %v1675_v52  ;;  %vm3744_vm14 = vmmov %vm3741_vm1 }
0x1488   : > { %2563 = vpow2.f32 %v2106_v54  ;;  %vm3745_vm2 = vmmov %vm3741_vm1 }
0x1489   : > { %2565 = vpow2.f32 %v2105_v56 }
0x1490   : > { %v2560_v34 = vpop.eup %2559 }
0x1491   : > { %v2562_v53 = vpop.eup %2561  ;;  %1697 = vrot.lane.b32.xlu0 %v2560_v34, %s2766_s10 }
0x1492   : > { %1695 = vrot.lane.b32.xlu1 %v2562_v53, %s2766_s10  ;;  %v2564_v57 = vpop.eup %2563 }
0x1493   : > { %v2566_v58 = vpop.eup %2565  ;;  %v1684_v59 = vadd.f32 1.0, %v2564_v57 }
0x1494   : > { %v1683_v60 = vadd.f32 1.0, %v2566_v58 }
0x1495   : > { %2567 = vrcp.f32 %v1684_v59 }
0x1496   : > { %2569 = vrcp.f32 %v1683_v60 }
0x149f   : > { %v3460_v5 = vpop.eup %2567 }
0x14a0   : > { %v3462_v10 = vpop.eup %2569  ;;  %v1692_v7 = vmul.f32 %v3460_v5, %v3480_v41 }
0x14a1   : > { %v1691_v18 = vmul.f32 %v3462_v10, %v3486_v4 }
0x1503   : > { %v1698_v6 = vpop.permute.xlu0 %1697 }
0x1504   : > { %v1702_v32 = vmul.f32 %v3460_v5, %v1698_v6  ;;  %v1696_v63 = vpop.permute.xlu1 %1695 }
0x1505   : > { %v1701_v33 = vmul.f32 %v3462_v10, %v1696_v63 }
0x1506   : > { %1707 = vrot.lane.b32.xlu0 %v1702_v32, %s2764_s27 }
0x1507   : > { %1705 = vrot.lane.b32.xlu1 %v1701_v33, %s2764_s27 }
0x150a   : > { %1734 = vperm.xlu0 %2445, %v1729_v2  }
0x150b   : > { %1731 = vperm.xlu1 %2446, %v1728_v39  }
0x1578   : > { %v1708_v24 = vpop.permute.xlu0 %1707 }
0x1579   : > { %v3492_v29 = vadd.f32 %v1708_v24, %v1692_v7  ;;  %v1706_v45 = vpop.permute.xlu1 %1705 }
0x157a   : > { %v3494_v46 = vadd.f32 %v1706_v45, %v1691_v18 }
0x157b   : > { %2571 = vtanh.f32 %v3492_v29 }
0x157c   : > { %2573 = vtanh.f32 %v3494_v46 }
0x1585   : > { %v2572_v9 = vpop.eup %2571 }
0x1586   : > { %v2574_v19 = vpop.eup %2573  ;;  %1719 = vrot.lane.b32.xlu0 %v2572_v9, %s2766_s10 }
0x1587   : > { %1717 = vrot.lane.b32.xlu1 %v2574_v19, %s2766_s10  ;;  %s2034_s10 = sshll.u32 %s2953_s22, 7 }
0x1588   : > { %s3560_s12 = scalar_lea.vmem [#allocation9], %s2034_s10 }
0x1589   : > { %v1735_v25 = vpop.permute.xlu0 %1734  ;;  %s523_s21 = scalar_lea.vmem %s3560_s12, %s2042_s14 [#allocation9]  ;;  %s1907_s13 = scalar_lea.vmem %s3560_s12, %s2050_s5 [#allocation9] }
0x158a   : > { %518 = vrot.lane.b32.xlu0 %v513_v27, %s2764_s27  ;;  %v1732_v28 = vpop.permute.xlu1 %1731  ;;  %vm1737_vm0 = vcmp.eq.s32.totalorder %v1735_v25, 1  ;;  %s1915_s26 = scalar_lea.vmem %s3560_s12, %s2060_s24 [#allocation9]  ;;  %s1225_s7 = scalar_lea.vmem %s3560_s12, %s2079_s11 [#allocation9] }
0x158b   : > { %516 = vrot.lane.b32.xlu1 %v512_v37, %s2764_s27  ;;  %vm1736_vm3 = vcmp.eq.s32.totalorder %v1732_v28, 1  ;;  %v1741_v1 = vsel %vm1737_vm0, %v3492_v29, %v3480_v41  ;;  %s1941_s10 = scalar_lea.vmem %s3560_s12, %s2097_s6 [#allocation9]  ;;  %s2107_s14 = smul.u32 4294967184, %s2747_s18 }
0x158c   : > { %v1740_v14 = vsel %vm1736_vm3, %v3494_v46, %v3486_v4  ;;  %s1807_s5 = sshll.u32 %s3560_s12, 4  ;;  %s2768_s6 = smov [#allocation9]   ;;  %s3612_s5 = int_to_ptr.vmem [resolvable:$true] %s1807_s5 }
0x158d   : > { %s1949_s24 = scalar_lea.vmem %s3560_s12, %s2107_s14 [#allocation9] }
0x158e   : > { %694 = vrot.lane.b32.xlu0 %v689_v47, %s2764_s27 }
0x158f   : > { %692 = vrot.lane.b32.xlu1 %v688_v50, %s2764_s27 }
0x1592   : > { %870 = vrot.lane.b32.xlu0 %v865_v48, %s2764_s27 }
0x1593   : > { %868 = vrot.lane.b32.xlu1 %v864_v49, %s2764_s27 }
0x1596   : > { %1045 = vrot.lane.b32.xlu0 %v1040_v51, %s2764_s27 }
0x1597   : > { %1043 = vrot.lane.b32.xlu1 %v1039_v55, %s2764_s27 }
0x159a   : > { %1220 = vrot.lane.b32.xlu0 %v1215_v35, %s2764_s27 }
0x159b   : > { %1218 = vrot.lane.b32.xlu1 %v1214_v36, %s2764_s27 }
0x159e   : > { %1396 = vrot.lane.b32.xlu0 %v1391_v38, %s2764_s27 }
0x159f   : > { %1394 = vrot.lane.b32.xlu1 %v1390_v40, %s2764_s27 }
0x15a2   : > { %1572 = vrot.lane.b32.xlu0 %v1567_v22, %s2764_s27 }
0x15a3   : > { %1570 = vrot.lane.b32.xlu1 %v1566_v23, %s2764_s27 }
0x15f8   : > { %v1720_v12 = vpop.permute.xlu0 %1719 }
0x15f9   : > { %v1724_v15 = vmul.f32 %v3460_v5, %v1720_v12  ;;  %v1718_v17 = vpop.permute.xlu1 %1717 }
0x15fa   : > { %v1723_v20 = vmul.f32 %v3462_v10, %v1718_v17 }
0x15fb   : > { %v1743_v3 = vsel %vm1737_vm0, %v1724_v15, 0.0  ;;  %v1739_v0 = vsel %vm1737_vm0, %v1724_v15, %v3441_v43  ;;  %vm3749_vm0 = vmmov %vm3741_vm1 }
0x15fc   : > { %1748 = vrot.lane.b32.xlu0 %v1743_v3, %s2764_s27  ;;  %v519_v13 = vpop.permute.xlu0 %518  ;;  %v1742_v16 = vsel %vm1736_vm3, %v1723_v20, 0.0  ;;  %v1738_v30 = vsel %vm1736_vm3, %v1723_v20, %v3449_v44  ;;  %vm3750_vm3 = vmmov %vm3749_vm0 }
0x15fd   : > { %525 = vst.msk [vmem:[%s523_s21 + $0x8] sm:$0xff] %vm3735_vm4, %v519_v13  ;;  %1746 = vrot.lane.b32.xlu1 %v1742_v16, %s2764_s27  ;;  %v517_v26 = vpop.permute.xlu1 %516 }
0x15fe   : > { %524 = vst.msk [vmem:[%s523_s21] sm:$0xff] %vm3736_vm7, %v517_v26  ;;  %s2035_s21 = sshll.u32 %s2953_s22, 4 }
0x1600   : > { %1760 = vrot.lane.b32.xlu0 %v1739_v0, %s2764_s27  ;;  %v695_v11 = vpop.permute.xlu0 %694 }
0x1601   : > { %2052 = vst.msk [vmem:[%s1907_s13 + $0x18] sm:$0xff] %vm3737_vm8, %v695_v11  ;;  %1758 = vrot.lane.b32.xlu1 %v1738_v30, %s2764_s27  ;;  %v693_v21 = vpop.permute.xlu1 %692  ;;  %s1921_s27 = scalar_lea.vmem %s3560_s12, %s2070_s8 [#allocation9] }
0x1602   : > { %2051 = vst.msk [vmem:[%s1907_s13 + $0x10] sm:$0xff] %vm3738_vm11, %v693_v21  ;;  %s2122_s13 = sshll.u32 %s2747_s18, 11 }
0x1604   : > { %1770 = vrot.lane.b32.xlu0 %v1741_v1, %s2767_s25  ;;  %v871_v31 = vpop.permute.xlu0 %870 }
0x1605   : > { %2062 = vst.msk [vmem:[%s1915_s26 + $0x28] sm:$0xff] %vm3739_vm12, %v871_v31  ;;  %1768 = vrot.lane.b32.xlu1 %v1740_v14, %s2767_s25  ;;  %v869_v42 = vpop.permute.xlu1 %868  ;;  %s1933_s25 = scalar_lea.vmem %s3560_s12, %s2087_s9 [#allocation9]  ;;  %s2123_s9 = sshll.u32 %s2747_s18, 8 }
0x1606   : > { %2061 = vst.msk [vmem:[%s1915_s26 + $0x20] sm:$0xff] %vm3740_vm15, %v869_v42  ;;  %s3614_s26 = scalar_lea.vmem [#allocation10], %s2035_s21  ;;  %s1782_s12 = scalar_lea.sflag [#allocation6], %s2953_s22 }
0x1607   : > { %s1823_s8 = sshll.u32 %s3614_s26, 4  ;;  %s3625_s8 = int_to_ptr.vmem [resolvable:$true] %s1823_s8 }
0x1608   : > { %v1046_v43 = vpop.permute.xlu0 %1045 }
0x1609   : > { %2072 = vst.msk [vmem:[%s1921_s27 + $0x38] sm:$0xff] %vm3741_vm1, %v1046_v43  ;;  %v1044_v44 = vpop.permute.xlu1 %1043 }
0x160a   : > { %2071 = vst.msk [vmem:[%s1921_s27 + $0x30] sm:$0xff] %vm3742_vm6, %v1044_v44 }
0x160c   : > { %v1221_v52 = vpop.permute.xlu0 %1220 }
0x160d   : > { %1227 = vst.msk [vmem:[%s1225_s7 + $0x8] sm:$0xff] %vm3743_vm9, %v1221_v52  ;;  %v1219_v34 = vpop.permute.xlu1 %1218 }
0x160e   : > { %1226 = vst.msk [vmem:[%s1225_s7] sm:$0xff] %vm3744_vm14, %v1219_v34  ;;  %s3620_s7 = scalar_lea.hbm %s3722_s3, %s2122_s13 }
0x1610   : > { %v1397_v53 = vpop.permute.xlu0 %1396 }
0x1611   : > { %2089 = vst.msk [vmem:[%s1933_s25 + $0x58] sm:$0xff] %vm3745_vm2, %v1397_v53  ;;  %v1395_v54 = vpop.permute.xlu1 %1394 }
0x1612   : > { %2088 = vst.msk [vmem:[%s1933_s25 + $0x50] sm:$0xff] %vm3746_vm13, %v1395_v54  ;;  %s2637_s25 = scalar_lea.vmem %s3612_s5, 2048 }
0x1613   : > { %p2638_p0 = scmp.ne.s32.totalorder %s3612_s5, %s2637_s25 }
0x1614   : > { %v1573_v56 = vpop.permute.xlu0 %1572 }
0x1615   : > { %2099 = vst.msk [vmem:[%s1941_s10 + $0x68] sm:$0xff] %vm3747_vm5, %v1573_v56  ;;  %v1571_v57 = vpop.permute.xlu1 %1570  ;;  %p2639_p11 = pnand %p2638_p0, %p3751_p3 }
0x1616   : > { %2098 = vst.msk [vmem:[%s1941_s10 + $0x60] sm:$0xff] %vm3748_vm10, %v1571_v57  ;;  %s2641_s10 = sshll.u32 %s2768_s6, 4  ;;  %s2642_s10 = int_to_ptr.vmem [resolvable:$false] %s2641_s10 }
0x1617   : > { %p2640_p13 = pneg %p2639_p11  ;;  %s2643_s14 = scalar_lea.vmem %s2642_s10, 4096 }
0x1618   : > { %p2644_p7 = scmp.lt.s32.totalorder %s3612_s5, %s2642_s10  ;;  %p2645_p10 = scmp.lt.s32.totalorder %s2643_s14, %s2637_s25 }
0x161a   : > { %p2646_p12 = por %p2645_p10, %p2644_p7 }
0x161c   : > { %p2647_p9 = pnand %p2646_p12, %p2640_p13 }
0x166e   : > { %v1749_v58 = vpop.permute.xlu0 %1748 }
0x166f   : > { %2109 = vst.msk [vmem:[%s1949_s24 + $0x78] sm:$0xff] %vm3749_vm0, %v1749_v58  ;;  %v1747_v59 = vpop.permute.xlu1 %1746 }
0x1670   : > { %2108 = vst.msk [vmem:[%s1949_s24 + $0x70] sm:$0xff] %vm3750_vm3, %v1747_v59 }
0x1671   : > { %2650 = shalt.err (!%p2647_p9)
}
0x1672   : > { %s2651_s21 = scalar_lea.hbm %s3620_s7, 2048  ;;  %s2655_s27 = scalar_lea.hbm %s3722_s3, 4096 }
0x1673   : > { %p2652_p1 = scmp.ne.s32.totalorder %s3620_s7, %s2651_s21  ;;  %p2656_p5 = scmp.lt.u32.totalorder %s3620_s7, %s3722_s3 }
0x1674   : > { %p2657_p4 = scmp.lt.u32.totalorder %s2655_s27, %s2651_s21  ;;  %p2659_p0 = scmp.lt.u32.totalorder %s2651_s21, %s3620_s7 }
0x1675   : > { %p2653_p6 = pnand %p2652_p1, %p3751_p3 }
0x1676   : > { %p2658_p8 = por %p2657_p4, %p2656_p5 }
0x1677   : > { %p2654_p2 = pneg %p2653_p6 }
0x1678   : > { %p2660_p11 = por %p2659_p0, %p2658_p8 }
0x167a   : > { %p2661_p13 = pnand %p2660_p11, %p2654_p2 }
0x167c   : > { %2664 = shalt.err (!%p2661_p13)
}
0x167d   : > { %s2769_s25 = smov 128   ;;  %s2770_s10 = smov 8   ;;  %v1761_v60 = vpop.permute.xlu0 %1760  ;;  %vm3752_vm4 = vmmov %vm3749_vm0  ;;  %v1759_v61 = vpop.permute.xlu1 %1758 }
0x167e   : > { %2366 = dma.vmem_to_hbm [thread:$0]  (%p3751_p3), %s3612_s5, 2048, %s3620_s7, %s1782_s12, %s2769_s25, %s2769_s25, %s2770_s10   ;;  %1765 = vst.msk [vmem:[#allocation2 + $0x8] sm:$0xff] %vm3752_vm4, %v1761_v60  ;;  %vm3753_vm7 = vmmov %vm3749_vm0 }
0x167f   : > { %s3659_s13 = scalar_lea.hbm %s3723_s4, %s2123_s9  ;;  %1780 = vst.msk [vmem:[%s3614_s26 + $0x8] sm:$0xff] %vm3753_vm7, %v1761_v60  ;;  %vm3754_vm8 = vmmov %vm3749_vm0  ;;  %s1787_s24 = scalar_lea.sflag [#allocation11], %s2953_s22 }
0x1680   : > { %1764 = vst.msk [vmem:[#allocation2] sm:$0xff] %vm3754_vm8, %v1759_v61  ;;  %vm3755_vm11 = vmmov %vm3749_vm0  ;;  %s2665_s27 = scalar_lea.vmem %s3625_s8, 256  ;;  %s2771_s18 = smov [#allocation10]  }
0x1681   : > { %1779 = vst.msk [vmem:[%s3614_s26] sm:$0xff] %vm3755_vm11, %v1759_v61  ;;  %p2666_p7 = scmp.ne.s32.totalorder %s3625_s8, %s2665_s27  ;;  %s2669_s5 = sshll.u32 %s2771_s18, 4  ;;  %s2670_s5 = int_to_ptr.vmem [resolvable:$false] %s2669_s5 }
0x1682   : > { %s2671_s7 = scalar_lea.vmem %s2670_s5, 512  ;;  %p2672_p9 = scmp.lt.s32.totalorder %s3625_s8, %s2670_s5 }
0x1683   : > { %p2667_p10 = pnand %p2666_p7, %p3751_p3  ;;  %p2673_p1 = scmp.lt.s32.totalorder %s2671_s7, %s2665_s27 }
0x1685   : > { %p2668_p12 = pneg %p2667_p10  ;;  %p2674_p6 = por %p2673_p1, %p2672_p9 }
0x1687   : > { %p2675_p2 = pnand %p2674_p6, %p2668_p12 }
0x1689   : > { %2678 = shalt.err (!%p2675_p2)
}
0x168a   : > { %s2679_s26 = scalar_lea.hbm %s3659_s13, 256  ;;  %s2683_s11 = scalar_lea.hbm %s3723_s4, 512 }
0x168b   : > { %p2680_p5 = scmp.ne.s32.totalorder %s3659_s13, %s2679_s26  ;;  %p2684_p0 = scmp.lt.u32.totalorder %s3659_s13, %s3723_s4 }
0x168c   : > { %p2685_p11 = scmp.lt.u32.totalorder %s2683_s11, %s2679_s26  ;;  %p2687_p7 = scmp.lt.u32.totalorder %s2679_s26, %s3659_s13 }
0x168d   : > { %p2681_p4 = pnand %p2680_p5, %p3751_p3 }
0x168e   : > { %p2686_p13 = por %p2685_p11, %p2684_p0 }
0x168f   : > { %p2682_p8 = pneg %p2681_p4 }
0x1690   : > { %p2688_p10 = por %p2687_p7, %p2686_p13 }
0x1692   : > { %p2689_p12 = pnand %p2688_p10, %p2682_p8 }
0x1694   : > { %2692 = shalt.err (!%p2689_p12)
}
0x1695   : > { %2367 = dma.vmem_to_hbm [thread:$0]  (%p3751_p3), %s3625_s8, 256, %s3659_s13, %s1787_s24, %s2769_s25, %s2769_s25, %s2770_s10   ;;  %v1771_v5 = vpop.permute.xlu0 %1770  ;;  %vm3756_vm12 = vmmov %vm3749_vm0  ;;  %v1769_v6 = vpop.permute.xlu1 %1768 }
0x1696   : > { %1775 = vst.msk [vmem:[#allocation3 + $0x8] sm:$0xff] %vm3756_vm12, %v1771_v5  ;;  %vm3757_vm15 = vmmov %vm3749_vm0 }
0x1697   : > { %1774 = vst.msk [vmem:[#allocation3] sm:$0xff] %vm3757_vm15, %v1769_v6 }
0x1698 PF: > { %s1838_s21 = sand.u32 1, %s2735_s15   ;;  %p3758_p9 = scmp.ne.s32.totalorder %s3730_s30, 0 }
0x1699   : > { %p3759_p1 = scmp.ge.s32.totalorder %s2755_s20, 2  ;;  %s1839_s28 = scalar_lea.sflag [#allocation6], %s1838_s21 }
0x169b   : > { %p2378_p6 = pnand %p3759_p1, %p3758_p9 }
0x169d   : > { %2726 = dma.done.wait (!%p2378_p6), %s1839_s28, 2048  }
0x169e   : > { %2728 = vsyncadd (!%p2378_p6), %s1839_s28, 4294965248  ;;  %s1848_s22 = scalar_lea.sflag [#allocation11], %s1838_s21 }
0x169f   : > { %2730 = dma.done.wait (!%p2378_p6), %s1848_s22, 256  }
0x16a0   : > { %2732 = vsyncadd (!%p2378_p6), %s1848_s22, 4294967040  ;;  %s27_s20 = sadd.s32 1, %s2755_s20   ;;  %s3760_s15 = smov %s2739_s16 }
0x16a1   : > { %p24_p3 = scmp.ge.s32.totalorder %s27_s20, 4   ;;  %s3761_s16 = smov %s2743_s17 }
0x16a2   : > { %s3762_s17 = smov %s2853_s29  ;;  %s3763_s18 = smov %s2751_s19 }
0x16a3   : > { %s3764_s19 = smov %s3766_s23  ;;  %26 = sbr.rel (!%p24_p3) target bundleno = 10 (0xa), region = 131 }
0x16aa   :  { %1853 = vsyncpa [#allocation5], 1 }
0x16ab   :  { %1855 = vsyncpa [#allocation5 + $0x1], 1 }
0x16ac   :  { %1856 = vsyncpa [#allocation8], 1 }
0x16ad   :  { %1858 = vsyncpa [#allocation8 + $0x1], 1 }
0x16ae   :  { %1859 = vsyncpa [#allocation6], 1 }
0x16af   :  { %1861 = vsyncpa [#allocation6 + $0x1], 1 }
0x16b0   :  { %1862 = vsyncpa [#allocation11], 1 }
0x16b1   :  { %1864 = vsyncpa [#allocation11 + $0x1], 1 }

</bundles_post_ra>
